<compile_context>
chip_gen: v7x
topology: tpu7x:2x2x1
jax: 0.10.0
libtpu: 0.0.40
codegen_flags: <defaults>
</compile_context>

<pallas_src>
import functools

import jax
import jax.numpy as jnp
import numpy as np
from jax.experimental import pallas as pl
from jax.experimental.pallas import tpu as pltpu

_LANE = 128


def _round_up(x, m):
    return (x + m - 1) // m * m


def _accumulate(a_ref, s_ref, acc_ref):
    """acc += A^T_tile(bf16) @ S_tile(bf16), f32 accumulation on the MXU."""
    @pl.when(pl.program_id(1) == 0)
    def _():
        acc_ref[...] = jnp.zeros_like(acc_ref)

    acc_ref[...] += jnp.dot(a_ref[...], s_ref[...],
                            preferred_element_type=jnp.float32)


def _gcn_layer1_kernel(a_ref, s_ref, b_ref, dis_ref, h_ref, acc_ref):
    """H_tile = relu( (A^T S)_tile * d_j^-1/2 + b1 ), K-streamed."""
    _accumulate(a_ref, s_ref, acc_ref)

    @pl.when(pl.program_id(1) == pl.num_programs(1) - 1)
    def _():
        h = acc_ref[...] * dis_ref[...] + b_ref[...]
        # TODO(synk): F.dropout(x, training=self.training) -- eval-mode identity used.
        h_ref[...] = jnp.maximum(h, 0.0).astype(h_ref.dtype)


def _gcn_layer2_kernel(a_ref, s_ref, b_ref, dis_ref, out_ref, acc_ref, *, n_cls):
    """out_tile = log_softmax( (A^T S)_tile * d_j^-1/2 + b2 ) over real class lanes."""
    _accumulate(a_ref, s_ref, acc_ref)

    @pl.when(pl.program_id(1) == pl.num_programs(1) - 1)
    def _():
        z = acc_ref[...] * dis_ref[...] + b_ref[...]
        # Mask zero-padded class lanes so they do not perturb the normalizer.
        lane = jax.lax.broadcasted_iota(jnp.int32, z.shape, 1)
        z = jnp.where(lane < n_cls, z, -jnp.inf)
        m = jnp.max(z, axis=1, keepdims=True)
        u = z - m
        lse = jnp.log(jnp.sum(jnp.exp(u), axis=1, keepdims=True))
        out_ref[...] = (u - lse).astype(out_ref.dtype)


def _gcn_propagate(kernel, a_t_bf16, s_bf16, b, dis_col, out_dtype, tm, tk):
    """Row(i)/K-tiled pallas_call for one GCN propagation layer."""
    n = a_t_bf16.shape[0]
    cols = s_bf16.shape[1]
    grid = (n // tm, n // tk)

    out_bytes = jnp.dtype(out_dtype).itemsize
    block_bytes = (2 * (tm * tk * 2)              # A^T tile (bf16), double-buffered
                   + 2 * (tk * cols * 2)          # S tile (bf16), double-buffered
                   + 2 * (cols * 4 + tm * 4)      # bias + d^-1/2 tiles
                   + 2 * (tm * cols * out_bytes)  # output tile
                   + tm * cols * 4)               # f32 accumulator scratch
    # Right-sized, hard-capped well under v7x's 64 MiB per-TensorCore VMEM.
    vmem_limit = int(min(max(8 << 20, 2 * block_bytes), 48 << 20))

    return pl.pallas_call(
        kernel,
        out_shape=jax.ShapeDtypeStruct((n, cols), out_dtype),
        grid=grid,
        in_specs=[
            pl.BlockSpec((tm, tk), lambda i, k: (i, k)),    # A^T row block (bf16, contiguous)
            pl.BlockSpec((tk, cols), lambda i, k: (k, 0)),  # hoisted transform S tile (bf16)
            pl.BlockSpec((1, cols), lambda i, k: (0, 0)),   # padded bias
            pl.BlockSpec((tm, 1), lambda i, k: (i, 0)),     # d^-1/2 for this row tile
        ],
        out_specs=pl.BlockSpec((tm, cols), lambda i, k: (i, 0)),
        scratch_shapes=[pltpu.VMEM((tm, cols), jnp.float32)],
        compiler_params=pltpu.CompilerParams(
            dimension_semantics=("parallel", "arbitrary"),
            vmem_limit_bytes=vmem_limit,
        ),
    )(a_t_bf16, s_bf16, b, dis_col)


def gcn_net_forward(adj_hat, x, w1, b1, w2, b2, *, tile_rows=128):
    n = adj_hat.shape[0]
    f_in = x.shape[1]
    hid = w1.shape[1]
    n_cls = w2.shape[1]

    hp = _round_up(max(hid, 1), _LANE)
    cp = _round_up(max(n_cls, 1), _LANE)
    n_pad = _round_up(n, tile_rows)

    # Lane-dense zero padding of the narrow hidden/class dims.
    w1p = jnp.zeros((f_in, hp), jnp.float32).at[:, :hid].set(w1)
    b1p = jnp.zeros((1, hp), jnp.float32).at[:, :hid].set(jnp.reshape(b1, (1, hid)))
    w2p = jnp.zeros((hp, cp), jnp.float32).at[:hid, :n_cls].set(w2)
    b2p = jnp.zeros((1, cp), jnp.float32).at[:, :n_cls].set(jnp.reshape(b2, (1, n_cls)))

    # Symmetric GCN normalization vector (once, outside the kernels); padded rows = 0,
    # so padded nodes contribute nothing and receive nothing.
    adj_f32 = adj_hat.astype(jnp.float32)
    deg = jnp.sum(adj_f32, axis=0)
    dis = jnp.where(deg > 0.0, jax.lax.rsqrt(deg), 0.0)
    dis_col = jnp.zeros((n_pad, 1), jnp.float32).at[:n, 0].set(dis)

    # Zero-pad N to a multiple of the row tile and pre-transpose A ONCE so the kernels
    # stream contiguous (tm, tk) row blocks in standard MXU orientation.
    # 0/1 adjacency entries are exact in bf16 -> lossless, half the HBM traffic.
    a_pad = jnp.zeros((n_pad, n_pad), jnp.float32).at[:n, :n].set(adj_f32)
    a_t_bf16 = jnp.transpose(a_pad).astype(jnp.bfloat16)

    x_pad = jnp.zeros((n_pad, f_in), jnp.float32).at[:n, :].set(x.astype(jnp.float32))

    tm = tile_rows
    tk = 512 if n_pad % 512 == 0 else (256 if n_pad % 256 == 0 else 128)
    tk = min(tk, n_pad)

    # Hoisted feature transforms: one small XLA matmul each (done once, not per tile),
    # with the source-node d^-1/2 scaling folded in; cast to bf16 for the MXU fast path.
    s1 = ((x_pad @ w1p) * dis_col).astype(jnp.bfloat16)
    h = _gcn_propagate(_gcn_layer1_kernel, a_t_bf16, s1, b1p, dis_col,
                       jnp.bfloat16, tm, tk)

    s2 = ((h.astype(jnp.float32) @ w2p) * dis_col).astype(jnp.bfloat16)
    logp_padded = _gcn_propagate(functools.partial(_gcn_layer2_kernel, n_cls=n_cls),
                                 a_t_bf16, s2, b2p, dis_col, jnp.float32, tm, tk)

    # Slice kept adjacent to the call: padded class lanes hold -inf and padded rows are
    # meaningless; only the real [n, n_cls] block is ever exposed.
    return logp_padded[:n, :n_cls]


def reference_forward_np(adj_hat, x, w1, b1, w2, b2):
    """float64 NumPy reference with identical semantics."""
    a = np.asarray(adj_hat, dtype=np.float64)
    deg = a.sum(axis=0)
    dis = np.where(deg > 0.0, 1.0 / np.sqrt(deg), 0.0)
    a_norm = dis[:, None] * a.T * dis[None, :]
    h = np.maximum(a_norm @ (np.asarray(x, np.float64) @ np.asarray(w1, np.float64))
                   + np.asarray(b1, np.float64), 0.0)
    z = a_norm @ (h @ np.asarray(w2, np.float64)) + np.asarray(b2, np.float64)
    z = z - z.max(axis=1, keepdims=True)
    return z - np.log(np.exp(z).sum(axis=1, keepdims=True))


if __name__ == "__main__":
    key = jax.random.PRNGKey(0)
    # N not a multiple of 128 -> exercises the row-padding path; still >1 row tile.
    N, F_IN, HID, N_CLS = 300, 32, 16, 8

    k_adj, k_x, k_w1, k_w2 = jax.random.split(key, 4)

    # Deterministic symmetric adjacency with self loops (what edge_to_adj builds).
    bern = jax.random.bernoulli(k_adj, 0.05, (N, N))
    off_diag = jnp.logical_or(bern, bern.T) & (~jnp.eye(N, dtype=bool))
    adj_hat = off_diag.astype(jnp.float32) + jnp.eye(N, dtype=jnp.float32)

    # Node features and GCNConv parameters (glorot-style, deterministic).
    x = jax.random.normal(k_x, (N, F_IN), dtype=jnp.float32)
    w1 = jax.random.normal(k_w1, (F_IN, HID), dtype=jnp.float32) * (1.0 / jnp.sqrt(F_IN))
    b1 = jnp.zeros((1, HID), dtype=jnp.float32)
    w2 = jax.random.normal(k_w2, (HID, N_CLS), dtype=jnp.float32) * (1.0 / jnp.sqrt(HID))
    b2 = jnp.zeros((1, N_CLS), dtype=jnp.float32)

    fwd = jax.jit(gcn_net_forward)
    out = jax.block_until_ready(fwd(adj_hat, x, w1, b1, w2, b2))

    ref = reference_forward_np(np.asarray(adj_hat), np.asarray(x), np.asarray(w1),
                               np.asarray(b1), np.asarray(w2), np.asarray(b2))
    assert out.shape == (N, N_CLS)
    # Tolerance re-validated for the bf16 S / bf16 A (f32-accumulate) fast path:
    # per-element rounding ~2^-9 relative; f32 accumulation keeps log-prob error < 1e-2.
    assert np.allclose(np.asarray(out, np.float64), ref, atol=3e-2, rtol=3e-2), \
        "mismatch vs. float64 NumPy reference"

    print("KERNEL_OK")
</pallas_src>

<mosaic_0001>
module attributes {stable_mosaic.version = 11 : i64} {
  func.func @_gcn_layer1_kernel(%arg0: i32, %arg1: i32, %arg2: memref<128x128xbf16, #tpu.memory_space<vmem>>, %arg3: memref<128x128xbf16, #tpu.memory_space<vmem>>, %arg4: memref<1x128xf32, #tpu.memory_space<vmem>>, %arg5: memref<128x1xf32, #tpu.memory_space<vmem>>, %arg6: memref<128x128xbf16, #tpu.memory_space<vmem>>, %arg7: memref<128x128xf32, #tpu.memory_space<vmem>>) attributes {dimension_semantics = [#tpu.dimension_semantics<parallel>, #tpu.dimension_semantics<arbitrary>], iteration_bounds = array<i64: 3, 3>, scalar_prefetch = 0 : i64, scratch_operands = 1 : i64, tpu.core_type = #tpu.core_type<tc>, window_params = [{transform_indices = @transform_0, window_bounds = array<i64: 128, 128>}, {transform_indices = @transform_1, window_bounds = array<i64: 128, 128>}, {pipeline_mode = #tpu.pipeline_mode<synchronous>, transform_indices = @transform_2, window_bounds = array<i64: 1, 128>}, {transform_indices = @transform_3, window_bounds = array<i64: 128, 1>}, {transform_indices = @transform_4, window_bounds = array<i64: 128, 128>}]} {
    %c0_i32 = arith.constant 0 : i32
    %0 = arith.cmpi eq, %arg1, %c0_i32 : i32
    %1 = arith.extui %0 : i1 to i32
    %c0_i32_0 = arith.constant 0 : i32
    %2 = arith.cmpi ne, %1, %c0_i32_0 : i32
    scf.if %2 {
      %cst_9 = arith.constant 0.000000e+00 : f32
      %12 = vector.broadcast %cst_9 : f32 to vector<128x128xf32>
      %c0_10 = arith.constant 0 : index
      %c0_11 = arith.constant 0 : index
      %13 = vector.load %arg7[%c0_10, %c0_11] : memref<128x128xf32, #tpu.memory_space<vmem>>, vector<128x128xf32>
      tpu.vector_store %arg7[%c0_10, %c0_11], %12 {strides = array<i32>} : memref<128x128xf32, #tpu.memory_space<vmem>>, vector<128x128xf32>,
    } else {
    }
    %c0 = arith.constant 0 : index
    %c0_1 = arith.constant 0 : index
    %3 = vector.load %arg7[%c0, %c0_1] : memref<128x128xf32, #tpu.memory_space<vmem>>, vector<128x128xf32>
    %c0_2 = arith.constant 0 : index
    %c0_3 = arith.constant 0 : index
    %4 = vector.load %arg2[%c0_2, %c0_3] : memref<128x128xbf16, #tpu.memory_space<vmem>>, vector<128x128xbf16>
    %c0_4 = arith.constant 0 : index
    %c0_5 = arith.constant 0 : index
    %5 = vector.load %arg3[%c0_4, %c0_5] : memref<128x128xbf16, #tpu.memory_space<vmem>>, vector<128x128xbf16>
    %cst = arith.constant dense<0.000000e+00> : vector<128x128xf32>
    %6 = tpu.matmul %4, %5, %cst {dimension_numbers = #tpu.dot_dimension_numbers<[1], [0], [0], [1], [0, 0, 1, 1], [], []>} : vector<128x128xbf16>, vector<128x128xbf16>, vector<128x128xf32> -> vector<128x128xf32>
    %7 = arith.addf %3, %6 : vector<128x128xf32>
    %c0_6 = arith.constant 0 : index
    %c0_7 = arith.constant 0 : index
    %8 = vector.load %arg7[%c0_6, %c0_7] : memref<128x128xf32, #tpu.memory_space<vmem>>, vector<128x128xf32>
    tpu.vector_store %arg7[%c0_6, %c0_7], %7 {strides = array<i32>} : memref<128x128xf32, #tpu.memory_space<vmem>>, vector<128x128xf32>,
    %c2_i32 = arith.constant 2 : i32
    %9 = arith.cmpi eq, %arg1, %c2_i32 : i32
    %10 = arith.extui %9 : i1 to i32
    %c0_i32_8 = arith.constant 0 : i32
    %11 = arith.cmpi ne, %10, %c0_i32_8 : i32
    scf.if %11 {
      %c0_9 = arith.constant 0 : index
      %c0_10 = arith.constant 0 : index
      %12 = vector.load %arg7[%c0_9, %c0_10] : memref<128x128xf32, #tpu.memory_space<vmem>>, vector<128x128xf32>
      %c0_11 = arith.constant 0 : index
      %c0_12 = arith.constant 0 : index
      %13 = vector.load %arg5[%c0_11, %c0_12] : memref<128x1xf32, #tpu.memory_space<vmem>>, vector<128x1xf32>
      %14 = vector.broadcast %13 : vector<128x1xf32> to vector<128x128xf32>
      %15 = arith.mulf %12, %14 : vector<128x128xf32>
      %c0_13 = arith.constant 0 : index
      %c0_14 = arith.constant 0 : index
      %16 = vector.load %arg4[%c0_13, %c0_14] : memref<1x128xf32, #tpu.memory_space<vmem>>, vector<1x128xf32>
      %17 = vector.broadcast %16 : vector<1x128xf32> to vector<128x128xf32>
      %18 = arith.addf %15, %17 : vector<128x128xf32>
      %cst_15 = arith.constant 0.000000e+00 : f32
      %19 = vector.broadcast %cst_15 : f32 to vector<128x128xf32>
      %20 = arith.maximumf %18, %19 : vector<128x128xf32>
      %21 = arith.truncf %20 : vector<128x128xf32> to vector<128x128xbf16>
      %c0_16 = arith.constant 0 : index
      %c0_17 = arith.constant 0 : index
      %22 = vector.load %arg6[%c0_16, %c0_17] : memref<128x128xbf16, #tpu.memory_space<vmem>>, vector<128x128xbf16>
      tpu.vector_store %arg6[%c0_16, %c0_17], %21 {strides = array<i32>} : memref<128x128xbf16, #tpu.memory_space<vmem>>, vector<128x128xbf16>,
    } else {
    }
    return
  }
  func.func @transform_0(%arg0: i32, %arg1: i32) -> (i32, i32) {
    %c0_i32 = arith.constant 0 : i32
    return %arg0, %arg1 : i32, i32
  }
  func.func @transform_1(%arg0: i32, %arg1: i32) -> (i32, i32) {
    %c0_i32 = arith.constant 0 : i32
    %c0_i32_0 = arith.constant 0 : i32
    return %arg1, %c0_i32 : i32, i32
  }
  func.func @transform_2(%arg0: i32, %arg1: i32) -> (i32, i32) {
    %c0_i32 = arith.constant 0 : i32
    %c0_i32_0 = arith.constant 0 : i32
    %c0_i32_1 = arith.constant 0 : i32
    return %c0_i32, %c0_i32_0 : i32, i32
  }
  func.func @transform_3(%arg0: i32, %arg1: i32) -> (i32, i32) {
    %c0_i32 = arith.constant 0 : i32
    %c0_i32_0 = arith.constant 0 : i32
    return %arg0, %c0_i32 : i32, i32
  }
  func.func @transform_4(%arg0: i32, %arg1: i32) -> (i32, i32) {
    %c0_i32 = arith.constant 0 : i32
    %c0_i32_0 = arith.constant 0 : i32
    return %arg0, %c0_i32 : i32, i32
  }
}

module attributes {stable_mosaic.version = 11 : i64} {
  func.func @_gcn_layer2_kernel(%arg0: i32, %arg1: i32, %arg2: memref<128x128xbf16, #tpu.memory_space<vmem>>, %arg3: memref<128x128xbf16, #tpu.memory_space<vmem>>, %arg4: memref<1x128xf32, #tpu.memory_space<vmem>>, %arg5: memref<128x1xf32, #tpu.memory_space<vmem>>, %arg6: memref<128x128xf32, #tpu.memory_space<vmem>>, %arg7: memref<128x128xf32, #tpu.memory_space<vmem>>) attributes {dimension_semantics = [#tpu.dimension_semantics<parallel>, #tpu.dimension_semantics<arbitrary>], iteration_bounds = array<i64: 3, 3>, scalar_prefetch = 0 : i64, scratch_operands = 1 : i64, tpu.core_type = #tpu.core_type<tc>, window_params = [{transform_indices = @transform_0, window_bounds = array<i64: 128, 128>}, {transform_indices = @transform_1, window_bounds = array<i64: 128, 128>}, {pipeline_mode = #tpu.pipeline_mode<synchronous>, transform_indices = @transform_2, window_bounds = array<i64: 1, 128>}, {transform_indices = @transform_3, window_bounds = array<i64: 128, 1>}, {transform_indices = @transform_4, window_bounds = array<i64: 128, 128>}]} {
    %c0_i32 = arith.constant 0 : i32
    %0 = arith.cmpi eq, %arg1, %c0_i32 : i32
    %1 = arith.extui %0 : i1 to i32
    %c0_i32_0 = arith.constant 0 : i32
    %2 = arith.cmpi ne, %1, %c0_i32_0 : i32
    scf.if %2 {
      %cst_9 = arith.constant 0.000000e+00 : f32
      %12 = vector.broadcast %cst_9 : f32 to vector<128x128xf32>
      %c0_10 = arith.constant 0 : index
      %c0_11 = arith.constant 0 : index
      %13 = vector.load %arg7[%c0_10, %c0_11] : memref<128x128xf32, #tpu.memory_space<vmem>>, vector<128x128xf32>
      tpu.vector_store %arg7[%c0_10, %c0_11], %12 {strides = array<i32>} : memref<128x128xf32, #tpu.memory_space<vmem>>, vector<128x128xf32>,
    } else {
    }
    %c0 = arith.constant 0 : index
    %c0_1 = arith.constant 0 : index
    %3 = vector.load %arg7[%c0, %c0_1] : memref<128x128xf32, #tpu.memory_space<vmem>>, vector<128x128xf32>
    %c0_2 = arith.constant 0 : index
    %c0_3 = arith.constant 0 : index
    %4 = vector.load %arg2[%c0_2, %c0_3] : memref<128x128xbf16, #tpu.memory_space<vmem>>, vector<128x128xbf16>
    %c0_4 = arith.constant 0 : index
    %c0_5 = arith.constant 0 : index
    %5 = vector.load %arg3[%c0_4, %c0_5] : memref<128x128xbf16, #tpu.memory_space<vmem>>, vector<128x128xbf16>
    %cst = arith.constant dense<0.000000e+00> : vector<128x128xf32>
    %6 = tpu.matmul %4, %5, %cst {dimension_numbers = #tpu.dot_dimension_numbers<[1], [0], [0], [1], [0, 0, 1, 1], [], []>} : vector<128x128xbf16>, vector<128x128xbf16>, vector<128x128xf32> -> vector<128x128xf32>
    %7 = arith.addf %3, %6 : vector<128x128xf32>
    %c0_6 = arith.constant 0 : index
    %c0_7 = arith.constant 0 : index
    %8 = vector.load %arg7[%c0_6, %c0_7] : memref<128x128xf32, #tpu.memory_space<vmem>>, vector<128x128xf32>
    tpu.vector_store %arg7[%c0_6, %c0_7], %7 {strides = array<i32>} : memref<128x128xf32, #tpu.memory_space<vmem>>, vector<128x128xf32>,
    %c2_i32 = arith.constant 2 : i32
    %9 = arith.cmpi eq, %arg1, %c2_i32 : i32
    %10 = arith.extui %9 : i1 to i32
    %c0_i32_8 = arith.constant 0 : i32
    %11 = arith.cmpi ne, %10, %c0_i32_8 : i32
    scf.if %11 {
      %c0_9 = arith.constant 0 : index
      %c0_10 = arith.constant 0 : index
      %12 = vector.load %arg7[%c0_9, %c0_10] : memref<128x128xf32, #tpu.memory_space<vmem>>, vector<128x128xf32>
      %c0_11 = arith.constant 0 : index
      %c0_12 = arith.constant 0 : index
      %13 = vector.load %arg5[%c0_11, %c0_12] : memref<128x1xf32, #tpu.memory_space<vmem>>, vector<128x1xf32>
      %14 = vector.broadcast %13 : vector<128x1xf32> to vector<128x128xf32>
      %15 = arith.mulf %12, %14 : vector<128x128xf32>
      %c0_13 = arith.constant 0 : index
      %c0_14 = arith.constant 0 : index
      %16 = vector.load %arg4[%c0_13, %c0_14] : memref<1x128xf32, #tpu.memory_space<vmem>>, vector<1x128xf32>
      %17 = vector.broadcast %16 : vector<1x128xf32> to vector<128x128xf32>
      %18 = arith.addf %15, %17 : vector<128x128xf32>
      %19 = tpu.iota {dimensions = array<i32: 1>} : vector<128x128xi32>
      %c8_i32 = arith.constant 8 : i32
      %20 = vector.broadcast %c8_i32 : i32 to vector<128x128xi32>
      %21 = arith.cmpi slt, %19, %20 : vector<128x128xi32>
      %cst_15 = arith.constant 0xFF800000 : f32
      %22 = vector.broadcast %cst_15 : f32 to vector<128x128xf32>
      %23 = arith.select %21, %18, %22 : vector<128x128xi1>, vector<128x128xf32>
      %cst_16 = arith.constant dense<0xFF800000> : vector<128xf32>
      %24 = vector.multi_reduction <maximumf>, %23, %cst_16 [1] : vector<128x128xf32> to vector<128xf32>
      %25 = vector.shape_cast %24 : vector<128xf32> to vector<128x1xf32>
      %26 = vector.broadcast %25 : vector<128x1xf32> to vector<128x128xf32>
      %27 = arith.subf %23, %26 : vector<128x128xf32>
      %28 = math.exp %27 : vector<128x128xf32>
      %cst_17 = arith.constant dense<0.000000e+00> : vector<128xf32>
      %29 = vector.multi_reduction <add>, %28, %cst_17 [1] : vector<128x128xf32> to vector<128xf32>
      %30 = vector.shape_cast %29 : vector<128xf32> to vector<128x1xf32>
      %31 = math.log %30 : vector<128x1xf32>
      %32 = vector.broadcast %31 : vector<128x1xf32> to vector<128x128xf32>
      %33 = arith.subf %27, %32 : vector<128x128xf32>
      %c0_18 = arith.constant 0 : index
      %c0_19 = arith.constant 0 : index
      %34 = vector.load %arg6[%c0_18, %c0_19] : memref<128x128xf32, #tpu.memory_space<vmem>>, vector<128x128xf32>
      tpu.vector_store %arg6[%c0_18, %c0_19], %33 {strides = array<i32>} : memref<128x128xf32, #tpu.memory_space<vmem>>, vector<128x128xf32>,
    } else {
    }
    return
  }
  func.func @transform_0(%arg0: i32, %arg1: i32) -> (i32, i32) {
    %c0_i32 = arith.constant 0 : i32
    return %arg0, %arg1 : i32, i32
  }
  func.func @transform_1(%arg0: i32, %arg1: i32) -> (i32, i32) {
    %c0_i32 = arith.constant 0 : i32
    %c0_i32_0 = arith.constant 0 : i32
    return %arg1, %c0_i32 : i32, i32
  }
  func.func @transform_2(%arg0: i32, %arg1: i32) -> (i32, i32) {
    %c0_i32 = arith.constant 0 : i32
    %c0_i32_0 = arith.constant 0 : i32
    %c0_i32_1 = arith.constant 0 : i32
    return %c0_i32, %c0_i32_0 : i32, i32
  }
  func.func @transform_3(%arg0: i32, %arg1: i32) -> (i32, i32) {
    %c0_i32 = arith.constant 0 : i32
    %c0_i32_0 = arith.constant 0 : i32
    return %arg0, %c0_i32 : i32, i32
  }
  func.func @transform_4(%arg0: i32, %arg1: i32) -> (i32, i32) {
    %c0_i32 = arith.constant 0 : i32
    %c0_i32_0 = arith.constant 0 : i32
    return %arg0, %c0_i32 : i32, i32
  }
}

</mosaic_0001>

<bundles_post_ra>
// kernel: gcn_net_forward.3
= control target key start
LH: loop header
LB: loop body
LE: loop exit
PB: predicated region body
PF: predicated region fallthrough
CT: control target
= control target key end

     0   :  { %s1431_s15 = smov 0   ;;  %s1433_s16 = smov 0   ;;  %s1786_s0 = inlined_call_operand.vmem [shape: bf16[384,384], index: 0, kind: input, shape index: {}]   ;;  %s1787_s1 = inlined_call_operand.vmem [shape: bf16[384,128], index: 1, kind: input, shape index: {}]   ;;  %s1788_s2 = inlined_call_operand.vmem [shape: f32[1,128], index: 2, kind: input, shape index: {}]   ;;  %s1789_s3 = inlined_call_operand.vmem [shape: f32[384,1], index: 3, kind: input, shape index: {}]   ;;  %s1790_s4 = inlined_call_operand.vmem [shape: f32[384,128], index: 4, kind: output, shape index: {}]  }
   0x1   :  { %s1435_s17 = smov 0   ;;  %s1437_s18 = smov 0  }
   0x2   :  { %s1439_s19 = smov 0   ;;  %s1441_s20 = smov 0  }
   0x3   :  { %s1443_s21 = smov 0  }
   0x4 LB: > { %s23_s22 = sadd.s32 1, %s1394_s19  ;;  %s26_s23 = sadd.s32 1, %s1398_s20  ;;  %s1402_s21 = sphi %s1443_s21, %s14_s21   ;;  %s1398_s20 = sphi %s1441_s20, %s1796_s20   ;;  %s1394_s19 = sphi %s1439_s19, %s1795_s19   ;;  %s1390_s18 = sphi %s1437_s18, %s1794_s18   ;;  %s1386_s17 = sphi %s1435_s17, %s1793_s17   ;;  %s1382_s16 = sphi %s1433_s16, %s1792_s16   ;;  %s1378_s15 = sphi %s1431_s15, %s1791_s15  }
   0x5   : > { %p24_p0 = scmp.ge.s32.totalorder %s23_s22, 3  ;;  %p42_p1 = scmp.ne.s32.totalorder %s1382_s16, %s1378_s15 }
   0x6   : > { %p43_p2 = scmp.eq.s32.totalorder %s1402_s21, 0  ;;  %s35_s27 = sadd.s32 1, %s1382_s16 }
   0x7   : > { %s1798_s22 = smov (%p24_p0, %s23_s22), 0  ;;  %s1800_s23 = smov (!%p24_p0, %s26_s23), %s1398_s20 }
   0x8   : > { %p44_p3 = por %p43_p2, %p42_p1  ;;  %p28_p4 = scmp.ge.s32.totalorder %s1800_s23, 3 }
   0x9   : > { %s31_s24 = ssub.s32 %s1394_s19, %s1798_s22  ;;  %p1109_p6 = scmp.ge.s32.totalorder %s1402_s21, 9 }
   0xa   : > { %s1802_s23 = smov (%p28_p4, %s1800_s23), 0 }
   0xb   : > { %s30_s25 = ssub.s32 %s1398_s20, %s1802_s23  ;;  %170 = sbr.rel (%p1109_p6) target bundleno = 35 (0x23), region = 20 }
   0xc   : > { %s32_s26 = sor.u32 %s31_s24, %s30_s25 }
   0xd   : > { %p33_p5 = scmp.eq.s32.totalorder %s32_s26, 0 }
   0xf   : > { %s1482_s28 = scalar_select %p33_p5, %s1382_s16, %s35_s27  }
  0x12   : > { %173 = sbr.rel (!%p44_p3) target bundleno = 35 (0x23), region = 24  ;;  %s175_s29 = sand.u32 (%p44_p3), 1, %s1382_s16  }
  0x13   : > { %s1207_s30 = smul.u32 (%p44_p3), 48, %s1398_s20  ;;  %s1110_s5 = sshll.u32 (%p44_p3), %s175_s29, 6 }
  0x14   : > { %s177_s11 = scalar_lea.vmem (%p44_p3), [#allocation3], %s1110_s5 }
  0x15   : > { %s180_s6 = sadd.s32 (%p44_p3), %s1394_s19, %s1207_s30 }
  0x16   : > { %s1113_s7 = sshll.u32 (%p44_p3), %s180_s6, 2 }
  0x17   : > { %s1491_s10 = scalar_lea.vmem (%p44_p3), %s1786_s0, %s1113_s7 }
  0x18   : > { %v198_v0 = vld [vmem:[%s1491_s10] sm:$0xf] (%p44_p3)  ;;  %v200_v1 = vld [vmem:[%s1491_s10 + $0xc] sm:$0xf] (%p44_p3)  ;;  %v202_v2 = vld [vmem:[%s1491_s10 + $0x18] sm:$0xf] (%p44_p3) }
  0x19   : > { %199 = vst [vmem:[%s177_s11] sm:$0xf] %v198_v0  ;;  %201 = vst [vmem:[%s177_s11 + $0x4] sm:$0xf] %v200_v1  ;;  %v204_v3 = vld [vmem:[%s1491_s10 + $0x24] sm:$0xf] }
  0x1a   : > { %203 = vst [vmem:[%s177_s11 + $0x8] sm:$0xf] %v202_v2  ;;  %v206_v4 = vld [vmem:[%s1491_s10 + $0x30] sm:$0xf]  ;;  %v208_v5 = vld [vmem:[%s1491_s10 + $0x3c] sm:$0xf] }
  0x1b   : > { %205 = vst [vmem:[%s177_s11 + $0xc] sm:$0xf] %v204_v3  ;;  %207 = vst [vmem:[%s177_s11 + $0x10] sm:$0xf] %v206_v4  ;;  %v210_v6 = vld [vmem:[%s1491_s10 + $0x48] sm:$0xf] }
  0x1c   : > { %209 = vst [vmem:[%s177_s11 + $0x14] sm:$0xf] %v208_v5  ;;  %v212_v7 = vld [vmem:[%s1491_s10 + $0x54] sm:$0xf]  ;;  %v214_v8 = vld [vmem:[%s1491_s10 + $0x60] sm:$0xf] }
  0x1d   : > { %211 = vst [vmem:[%s177_s11 + $0x18] sm:$0xf] %v210_v6  ;;  %213 = vst [vmem:[%s177_s11 + $0x1c] sm:$0xf] %v212_v7  ;;  %v216_v9 = vld [vmem:[%s1491_s10 + $0x6c] sm:$0xf] }
  0x1e   : > { %215 = vst [vmem:[%s177_s11 + $0x20] sm:$0xf] %v214_v8  ;;  %v218_v10 = vld [vmem:[%s1491_s10 + $0x78] sm:$0xf]  ;;  %v220_v11 = vld [vmem:[%s1491_s10 + $0x84] sm:$0xf] }
  0x1f   : > { %217 = vst [vmem:[%s177_s11 + $0x24] sm:$0xf] %v216_v9  ;;  %219 = vst [vmem:[%s177_s11 + $0x28] sm:$0xf] %v218_v10  ;;  %v222_v12 = vld [vmem:[%s1491_s10 + $0x90] sm:$0xf] }
  0x20   : > { %221 = vst [vmem:[%s177_s11 + $0x2c] sm:$0xf] %v220_v11  ;;  %v224_v13 = vld [vmem:[%s1491_s10 + $0x9c] sm:$0xf]  ;;  %v226_v14 = vld [vmem:[%s1491_s10 + $0xa8] sm:$0xf] }
  0x21   : > { %223 = vst [vmem:[%s177_s11 + $0x30] sm:$0xf] %v222_v12  ;;  %225 = vst [vmem:[%s177_s11 + $0x34] sm:$0xf] %v224_v13  ;;  %v228_v15 = vld [vmem:[%s1491_s10 + $0xb4] sm:$0xf] }
  0x22   : > { %227 = vst [vmem:[%s177_s11 + $0x38] sm:$0xf] %v226_v14  ;;  %229 = vst [vmem:[%s177_s11 + $0x3c] sm:$0xf] %v228_v15 }
  0x23 PF: > { %p1114_p7 = scmp.ge.s32.totalorder %s1402_s21, 1  ;;  %p301_p8 = scmp.lt.s32.totalorder %s1402_s21, 10 }
  0x25   : > { %p302_p9 = pnand %p1114_p7, %p301_p8 }
  0x26   : > { %s308_s12 = sand.u32 (!%p302_p9), 1, %s1378_s15   ;;  %s1116_s13 = sshll.u32 (!%p302_p9), %s1386_s17, 4 }
  0x27   : > { %305 = sbr.rel (%p302_p9) target bundleno = 755 (0x2f3), region = 73  ;;  %s1115_s14 = sshll.u32 (!%p302_p9), %s308_s12, 6 }
  0x28   : > { %p345_p10 = scmp.lt.s32.totalorder (!%p302_p9), %s1116_s13, 47  ;;  %s1118_s24 = sshll.u32 (!%p302_p9), %s1390_s18, 4 }
  0x29   : > { %p351_p11 = scmp.lt.s32.totalorder (!%p302_p9), %s1118_s24, 47  ;;  %s1529_s18 = scalar_lea.vmem (!%p302_p9), [#allocation3], %s1115_s14 }
  0x2a   : > { %p1122_p12 = scmp.ne.s32.totalorder (!%p302_p9), %s1386_s17, 0 }
  0x2e   : > { %s1804_s13 = smov (!%p345_p10, %s1116_s13), 47  ;;  %s1806_s24 = smov (!%p351_p11, %s1118_s24), 47 }
  0x2f   : > { %s1117_s25 = sshll.u32 %s1804_s13, 2  ;;  %s1119_s30 = sshll.u32 %s1806_s24, 3  ;;  %v1404_v16 = vmov (!%p1122_p12), 0.0  }
  0x30   : > { %s1517_s29 = scalar_lea.vmem %s1787_s1, %s1117_s25  ;;  %s1522_s7 = scalar_lea.vmem %s1789_s3, %s1119_s30  ;;  %367 = vst [vmem:[#allocation2] sm:$0xff] (!%p1122_p12), %v1404_v16  ;;  %368 = vst [vmem:[#allocation2 + $0x8] sm:$0xff] (!%p1122_p12), %v1404_v16 }
  0x31   : > { %s1527_s9 = scalar_lea.vmem %s1790_s4, %s1119_s30  ;;  %366 = sbr.rel (%p1122_p12) target bundleno = 56 (0x38), region = 81  ;;  %369 = vst [vmem:[#allocation2 + $0x10] sm:$0xff] (!%p1122_p12), %v1404_v16  ;;  %370 = vst [vmem:[#allocation2 + $0x18] sm:$0xff] (!%p1122_p12), %v1404_v16 }
  0x32   : > { %371 = vst [vmem:[#allocation2 + $0x20] sm:$0xff] (!%p1122_p12), %v1404_v16  ;;  %372 = vst [vmem:[#allocation2 + $0x28] sm:$0xff] (!%p1122_p12), %v1404_v16 }
  0x33   : > { %373 = vst [vmem:[#allocation2 + $0x30] sm:$0xff] (!%p1122_p12), %v1404_v16  ;;  %374 = vst [vmem:[#allocation2 + $0x38] sm:$0xff] (!%p1122_p12), %v1404_v16 }
  0x34   : > { %375 = vst [vmem:[#allocation2 + $0x40] sm:$0xff] (!%p1122_p12), %v1404_v16  ;;  %376 = vst [vmem:[#allocation2 + $0x48] sm:$0xff] (!%p1122_p12), %v1404_v16 }
  0x35   : > { %377 = vst [vmem:[#allocation2 + $0x50] sm:$0xff] (!%p1122_p12), %v1404_v16  ;;  %378 = vst [vmem:[#allocation2 + $0x58] sm:$0xff] (!%p1122_p12), %v1404_v16 }
  0x36   : > { %379 = vst [vmem:[#allocation2 + $0x60] sm:$0xff] (!%p1122_p12), %v1404_v16  ;;  %380 = vst [vmem:[#allocation2 + $0x68] sm:$0xff] (!%p1122_p12), %v1404_v16 }
  0x37   : > { %381 = vst [vmem:[#allocation2 + $0x70] sm:$0xff] (!%p1122_p12), %v1404_v16  ;;  %382 = vst [vmem:[#allocation2 + $0x78] sm:$0xff] (!%p1122_p12), %v1404_v16 }
  0x38 PF: > { %v1266_v17 = vld [vmem:[%s1517_s29] sm:$0xff]   ;;  %v1267_v18 = vld [vmem:[%s1517_s29 + $0x8] sm:$0xff]   ;;  %v1268_v19 = vld [vmem:[%s1517_s29 + $0x10] sm:$0xff]   ;;  %p1139_p13 = scmp.ne.s32.totalorder %s1386_s17, 2 }
  0x39   : > { %1159 = vmatprep.subr.bf16.mxu0 %v1266_v17  ;;  %1191 = vmatprep.subr.bf16.mxu1 %v1266_v17  ;;  %v1269_v20 = vld [vmem:[%s1517_s29 + $0x18] sm:$0xff]   ;;  %v1274_v21 = vld [vmem:[%s1529_s18] sm:$0xff]   ;;  %v1271_v24 = vld [vmem:[%s1517_s29 + $0x28] sm:$0xff]  }
  0x3a   : > { %1160 = vmatpush3.bf16.msra.mxu0 %v1266_v17  ;;  %1199 = vmatpush3.bf16.msra.mxu1 %v1266_v17  ;;  %v1275_v22 = vld [vmem:[%s1529_s18 + $0x20] sm:$0xff]   ;;  %v1272_v25 = vld [vmem:[%s1517_s29 + $0x30] sm:$0xff]   ;;  %v1273_v26 = vld [vmem:[%s1517_s29 + $0x38] sm:$0xff]  }
  0x3b   : > { %1161 = vmatprep.subr.bf16.mxu0 %v1267_v18  ;;  %1192 = vmatprep.subr.bf16.mxu1 %v1267_v18  ;;  %v1270_v23 = vld [vmem:[%s1517_s29 + $0x20] sm:$0xff]   ;;  %v1276_v27 = vld [vmem:[%s1529_s18 + $0x8] sm:$0xff]   ;;  %v1278_v29 = vld [vmem:[%s1529_s18 + $0x10] sm:$0xff]  }
  0x3c   : > { %1175 = vmatprep.mubr.bf16.mxu0 %v1274_v21  ;;  %1183 = vmatprep.mubr.bf16.mxu1 %v1275_v22  ;;  %v1277_v28 = vld [vmem:[%s1529_s18 + $0x28] sm:$0xff]   ;;  %v1279_v30 = vld [vmem:[%s1529_s18 + $0x30] sm:$0xff]   ;;  %v1280_v31 = vld [vmem:[%s1529_s18 + $0x18] sm:$0xff]  }
  0x3d   : > { %v1281_v32 = vld [vmem:[%s1529_s18 + $0x38] sm:$0xff]   ;;  %v385_v33 = vld [vmem:[#allocation2 + $0x10] sm:$0xff]  ;;  %v383_v35 = vld [vmem:[#allocation2] sm:$0xff] }
  0x3e   : > { %1162 = vmatpush3.bf16.msra.mxu0 %v1267_v18  ;;  %1200 = vmatpush3.bf16.msra.mxu1 %v1267_v18  ;;  %v393_v34 = vld [vmem:[#allocation2 + $0x50] sm:$0xff]  ;;  %v391_v36 = vld [vmem:[#allocation2 + $0x40] sm:$0xff]  ;;  %v386_v39 = vld [vmem:[#allocation2 + $0x18] sm:$0xff] }
  0x3f   : > { %1163 = vmatprep.subr.bf16.mxu0 %v1268_v19  ;;  %1193 = vmatprep.subr.bf16.mxu1 %v1268_v19  ;;  %v394_v40 = vld [vmem:[#allocation2 + $0x58] sm:$0xff]  ;;  %v384_v45 = vld [vmem:[#allocation2 + $0x8] sm:$0xff]  ;;  %v389_v57 = vld [vmem:[#allocation2 + $0x30] sm:$0xff] }
  0x40   : > { %v392_v46 = vld [vmem:[#allocation2 + $0x48] sm:$0xff]  ;;  %v397_v58 = vld [vmem:[#allocation2 + $0x70] sm:$0xff]  ;;  %v387_v59 = vld [vmem:[#allocation2 + $0x20] sm:$0xff] }
  0x41   : > { %v395_v60 = vld [vmem:[#allocation2 + $0x60] sm:$0xff]  ;;  %v390_v63 = vld [vmem:[#allocation2 + $0x38] sm:$0xff]  ;;  %v388_v5 = vld [vmem:[#allocation2 + $0x28] sm:$0xff] }
  0x42   : > { %1164 = vmatpush3.bf16.msra.mxu0 %v1268_v19  ;;  %1201 = vmatpush3.bf16.msra.mxu1 %v1268_v19  ;;  %v398_v0 = vld [vmem:[#allocation2 + $0x78] sm:$0xff]  ;;  %v396_v6 = vld [vmem:[#allocation2 + $0x68] sm:$0xff]  ;;  %v678_v17 = vld [vmem:[%s1522_s7 + $0x10] sm:$0xff] (!%p1139_p13)  ;;  %v1405_v19 = vmov (!%p1139_p13), 0  }
  0x43   : > { %1165 = vmatprep.subr.bf16.mxu0 %v1269_v20  ;;  %1194 = vmatprep.subr.bf16.mxu1 %v1269_v20  ;;  %v676_v18 = vld [vmem:[%s1522_s7] sm:$0xff] (!%p1139_p13)  ;;  %v677_v21 = vld [vmem:[%s1522_s7 + $0x8] sm:$0xff] (!%p1139_p13) }
  0x44   : > { %1283 = vset.pattern.permute.xlu1 (!%p1139_p13), %v1405_v19  ;;  %1282 = vset.pattern.permute.xlu0 (!%p1139_p13), %v1405_v19  ;;  %v681_v22 = vld [vmem:[%s1522_s7 + $0x28] sm:$0xff] (!%p1139_p13) }
  0x45   : > { %704 = vperm.xlu1 (!%p1139_p13), %1283, %v678_v17   ;;  %694 = vperm.xlu0 (!%p1139_p13), %1282, %v676_v18  }
  0x46   : > { %1166 = vmatpush3.bf16.msra.mxu0 %v1269_v20  ;;  %1202 = vmatpush3.bf16.msra.mxu1 %v1269_v20  ;;  %v679_v20 = vld [vmem:[%s1522_s7 + $0x18] sm:$0xff] (!%p1139_p13) }
  0x47   : > { %1167 = vmatprep.subr.bf16.mxu0 %v1270_v23  ;;  %1195 = vmatprep.subr.bf16.mxu1 %v1270_v23 }
  0x49   : > { %709 = vperm.xlu1 (!%p1139_p13), %1283, %v679_v20   ;;  %699 = vperm.xlu0 (!%p1139_p13), %1282, %v677_v21  }
  0x4a   : > { %1168 = vmatpush3.bf16.msra.mxu0 %v1270_v23  ;;  %1203 = vmatpush3.bf16.msra.mxu1 %v1270_v23  ;;  %v680_v23 = vld [vmem:[%s1522_s7 + $0x20] sm:$0xff] (!%p1139_p13) }
  0x4b   : > { %1169 = vmatprep.subr.bf16.mxu0 %v1271_v24  ;;  %1196 = vmatprep.subr.bf16.mxu1 %v1271_v24 }
  0x4d   : > { %719 = vperm.xlu1 (!%p1139_p13), %1283, %v681_v22   ;;  %714 = vperm.xlu0 (!%p1139_p13), %1282, %v680_v23  }
  0x4e   : > { %1170 = vmatpush3.bf16.msra.mxu0 %v1271_v24  ;;  %1204 = vmatpush3.bf16.msra.mxu1 %v1271_v24  ;;  %v683_v24 = vld [vmem:[%s1522_s7 + $0x38] sm:$0xff] (!%p1139_p13) }
  0x4f   : > { %1171 = vmatprep.subr.bf16.mxu0 %v1272_v25  ;;  %1197 = vmatprep.subr.bf16.mxu1 %v1272_v25 }
  0x51   : > { %729 = vperm.xlu1 (!%p1139_p13), %1283, %v683_v24  }
  0x52   : > { %1172 = vmatpush3.bf16.msra.mxu0 %v1272_v25  ;;  %1205 = vmatpush3.bf16.msra.mxu1 %v1272_v25  ;;  %v682_v25 = vld [vmem:[%s1522_s7 + $0x30] sm:$0xff] (!%p1139_p13) }
  0x53   : > { %1173 = vmatprep.subr.bf16.mxu0 %v1273_v26  ;;  %1198 = vmatprep.subr.bf16.mxu1 %v1273_v26 }
  0x54   : > { %724 = vperm.xlu0 (!%p1139_p13), %1282, %v682_v25  }
  0x56   : > { %1174 = vmatpush3.bf16.msra.mxu0 %v1273_v26  ;;  %1206 = vmatpush3.bf16.msra.mxu1 %v1273_v26  ;;  %v685_v26 = vld [vmem:[%s1522_s7 + $0x48] sm:$0xff] (!%p1139_p13) }
  0x57   : > { %739 = vperm.xlu1 (!%p1139_p13), %1283, %v685_v26  }
  0x59   : > { %1176 = vmatmul.mubr.bf16.vlgmr.msra.gmra.mrb[0].mxu0 %v1276_v27  ;;  %1184 = vmatmul.mubr.bf16.vlgmr.msra.gmra.mrb[0].mxu1 %v1277_v28  ;;  %v684_v27 = vld [vmem:[%s1522_s7 + $0x40] sm:$0xff] (!%p1139_p13)  ;;  %v687_v28 = vld [vmem:[%s1522_s7 + $0x58] sm:$0xff] (!%p1139_p13) }
  0x5a   : > { %1179 = vmatprep.mubr.bf16.mxu0 %v1278_v29  ;;  %1187 = vmatprep.mubr.bf16.mxu1 %v1279_v30  ;;  %v686_v29 = vld [vmem:[%s1522_s7 + $0x50] sm:$0xff] (!%p1139_p13)  ;;  %v689_v30 = vld [vmem:[%s1522_s7 + $0x68] sm:$0xff] (!%p1139_p13) }
  0x5b   : > { %734 = vperm.xlu0 (!%p1139_p13), %1282, %v684_v27   ;;  %749 = vperm.xlu1 (!%p1139_p13), %1283, %v687_v28  }
  0x5f   : > { %744 = vperm.xlu0 (!%p1139_p13), %1282, %v686_v29   ;;  %759 = vperm.xlu1 (!%p1139_p13), %1283, %v689_v30  }
  0x61   : > { %1180 = vmatmul.mubr.bf16.gmra.mrb[4].mxu0 %v1280_v31  ;;  %1188 = vmatmul.mubr.bf16.gmra.mrb[4].mxu1 %v1281_v32  ;;  %v688_v31 = vld [vmem:[%s1522_s7 + $0x60] sm:$0xff] (!%p1139_p13)  ;;  %v691_v32 = vld [vmem:[%s1522_s7 + $0x78] sm:$0xff] (!%p1139_p13) }
  0x63   : > { %754 = vperm.xlu0 (!%p1139_p13), %1282, %v688_v31   ;;  %769 = vperm.xlu1 (!%p1139_p13), %1283, %v691_v32  }
 0x12c   : > { %v1177_v37 = vpop.f32.mrb[0].mxu0  ;;  %v1185_v38 = vpop.f32.mrb[0].mxu1 }
 0x12d   : > { %v626_v41 = vadd.f32 %v1177_v37, %v385_v33  ;;  %v634_v42 = vadd.f32 %v1185_v38, %v393_v34  ;;  %v561_v43 = vpop.f32.mrb[1].mxu0  ;;  %v593_v44 = vpop.f32.mrb[1].mxu1  ;;  %v690_v33 = vld [vmem:[%s1522_s7 + $0x70] sm:$0xff] (!%p1139_p13)  ;;  %v811_v34 = vlaneseq (!%p1139_p13) }
 0x12e   : > { %v624_v47 = vadd.f32 %v561_v43, %v383_v35  ;;  %v632_v48 = vadd.f32 %v593_v44, %v391_v36  ;;  %v1178_v49 = vpop.f32.mrb[2].mxu0  ;;  %v1186_v50 = vpop.f32.mrb[2].mxu1  ;;  %764 = vperm.xlu0 (!%p1139_p13), %1282, %v690_v33  }
 0x12f   : > { %642 = vst [vmem:[#allocation2 + $0x10] sm:$0xff] %v626_v41  ;;  %650 = vst [vmem:[#allocation2 + $0x50] sm:$0xff] %v634_v42  ;;  %v627_v51 = vadd.f32 %v1178_v49, %v386_v39  ;;  %v635_v52 = vadd.f32 %v1186_v50, %v394_v40  ;;  %v564_v53 = vpop.f32.mrb[3].mxu0  ;;  %v596_v54 = vpop.f32.mrb[3].mxu1  ;;  %v1565_v37 = vand.u32 (!%p1139_p13), 127, %v811_v34 }
 0x130   : > { %640 = vst [vmem:[#allocation2] sm:$0xff] %v624_v47  ;;  %648 = vst [vmem:[#allocation2 + $0x40] sm:$0xff] %v632_v48  ;;  %v625_v55 = vadd.f32 %v564_v53, %v384_v45  ;;  %v633_v56 = vadd.f32 %v596_v54, %v392_v46  ;;  %v705_v38 = vpop.permute.xlu1 (!%p1139_p13), %704  ;;  %v695_v39 = vpop.permute.xlu0 (!%p1139_p13), %694  ;;  %v1570_v40 = vld [vmem:[%s1788_s2] ss:$0 sm:$0xff] (!%p1139_p13) }
 0x131   : > { %643 = vst [vmem:[#allocation2 + $0x18] sm:$0xff] %v627_v51  ;;  %651 = vst [vmem:[#allocation2 + $0x58] sm:$0xff] %v635_v52  ;;  %vm813_vm0 = vcmp.lt.s32.totalorder (!%p1139_p13), %v1565_v37, 8 }
 0x132   : > { %641 = vst [vmem:[#allocation2 + $0x8] sm:$0xff] %v625_v55  ;;  %649 = vst [vmem:[#allocation2 + $0x48] sm:$0xff] %v633_v56 }
 0x134   : > { %v1181_v61 = vpop.f32.mrb[4].mxu0  ;;  %v1189_v62 = vpop.f32.mrb[4].mxu1  ;;  %659 = sbr.rel (%p1139_p13) target bundleno = 755 (0x2f3), region = 85 }
 0x135   : > { %v630_v1 = vadd.f32 %v1181_v61, %v389_v57  ;;  %v638_v2 = vadd.f32 %v1189_v62, %v397_v58  ;;  %v577_v3 = vpop.f32.mrb[5].mxu0  ;;  %v609_v4 = vpop.f32.mrb[5].mxu1 }
 0x136   : > { %v628_v7 = vadd.f32 %v577_v3, %v387_v59  ;;  %v636_v8 = vadd.f32 %v609_v4, %v395_v60  ;;  %v1182_v9 = vpop.f32.mrb[6].mxu0  ;;  %v1190_v10 = vpop.f32.mrb[6].mxu1  ;;  %v662_v35 = vld [vmem:[#allocation2 + $0x10] sm:$0xff] (!%p1139_p13) }
 0x137   : > { %646 = vst [vmem:[#allocation2 + $0x30] sm:$0xff] %v630_v1  ;;  %654 = vst [vmem:[#allocation2 + $0x70] sm:$0xff] %v638_v2  ;;  %v631_v11 = vadd.f32 %v1182_v9, %v390_v63  ;;  %v639_v12 = vadd.f32 %v1190_v10, %v398_v0  ;;  %v580_v13 = vpop.f32.mrb[7].mxu0  ;;  %v612_v14 = vpop.f32.mrb[7].mxu1  ;;  %v660_v36 = vld [vmem:[#allocation2] sm:$0xff] (!%p1139_p13)  ;;  %v774_v41 = vmul.f32 (!%p1139_p13), %v705_v38, %v662_v35  ;;  %v670_v19 = vld [vmem:[#allocation2 + $0x50] sm:$0xff] (!%p1139_p13) }
 0x138   : > { %644 = vst [vmem:[#allocation2 + $0x20] sm:$0xff] %v628_v7  ;;  %652 = vst [vmem:[#allocation2 + $0x60] sm:$0xff] %v636_v8  ;;  %v629_v15 = vadd.f32 %v580_v13, %v388_v5  ;;  %v637_v16 = vadd.f32 %v612_v14, %v396_v6  ;;  %v772_v42 = vmul.f32 (!%p1139_p13), %v695_v39, %v660_v36  ;;  %v663_v43 = vld [vmem:[#allocation2 + $0x18] sm:$0xff] (!%p1139_p13)  ;;  %v710_v47 = vpop.permute.xlu1 (!%p1139_p13), %709  ;;  %v700_v48 = vpop.permute.xlu0 (!%p1139_p13), %699  ;;  %v668_v9 = vld [vmem:[#allocation2 + $0x40] sm:$0xff] (!%p1139_p13) }
 0x139   : > { %647 = vst [vmem:[#allocation2 + $0x38] sm:$0xff] %v631_v11  ;;  %655 = vst [vmem:[#allocation2 + $0x78] sm:$0xff] %v639_v12  ;;  %v661_v44 = vld [vmem:[#allocation2 + $0x8] sm:$0xff] (!%p1139_p13)  ;;  %v797_v46 = vadd.f32 (!%p1139_p13), %v1570_v40, %v774_v41  ;;  %v775_v49 = vmul.f32 (!%p1139_p13), %v710_v47, %v663_v43  ;;  %v671_v18 = vld [vmem:[#allocation2 + $0x58] sm:$0xff] (!%p1139_p13) }
 0x13a   : > { %645 = vst [vmem:[#allocation2 + $0x28] sm:$0xff] %v629_v15  ;;  %653 = vst [vmem:[#allocation2 + $0x68] sm:$0xff] %v637_v16  ;;  %v795_v45 = vadd.f32 (!%p1139_p13), %v1570_v40, %v772_v42  ;;  %v773_v50 = vmul.f32 (!%p1139_p13), %v700_v48, %v661_v44  ;;  %v669_v8 = vld [vmem:[#allocation2 + $0x48] sm:$0xff] (!%p1139_p13) }
 0x13b   : > { %v1583_v55 = vsel %vm813_vm0, %v797_v46, -inf  ;;  %v798_v58 = vadd.f32 %v1570_v40, %v775_v49 }
 0x13c   : > { %v1577_v51 = vsel %vm813_vm0, %v795_v45, -inf  ;;  %v796_v54 = vadd.f32 %v1570_v40, %v773_v50  ;;  %v720_v56 = vpop.permute.xlu1 %719  ;;  %v715_v57 = vpop.permute.xlu0 %714 }
 0x13d   : > { %v1595_v3 = vsel %vm813_vm0, %v798_v58, -inf }
 0x13e   : > { %v1588_v61 = vsel %vm813_vm0, %v796_v54, -inf  ;;  %v666_v63 = vld [vmem:[#allocation2 + $0x30] sm:$0xff] }
 0x13f   : > { %v664_v53 = vld [vmem:[#allocation2 + $0x20] sm:$0xff]  ;;  %832 = vmax.xlane.f32.xlu1 %v1588_v61  ;;  %v674_v41 = vld [vmem:[#allocation2 + $0x70] sm:$0xff] }
 0x140   : > { %v776_v60 = vmul.f32 %v715_v57, %v664_v53  ;;  %v667_v62 = vld [vmem:[#allocation2 + $0x38] sm:$0xff]  ;;  %v730_v1 = vpop.permute.xlu1 %729  ;;  %v725_v2 = vpop.permute.xlu0 %724  ;;  %v672_v29 = vld [vmem:[#allocation2 + $0x60] sm:$0xff] }
 0x141   : > { %v665_v52 = vld [vmem:[#allocation2 + $0x28] sm:$0xff]  ;;  %v779_v4 = vmul.f32 %v730_v1, %v667_v62  ;;  %v778_v5 = vmul.f32 %v725_v2, %v666_v63  ;;  %v675_v39 = vld [vmem:[#allocation2 + $0x78] sm:$0xff] }
 0x142   : > { %v777_v59 = vmul.f32 %v720_v56, %v665_v52  ;;  %v799_v0 = vadd.f32 %v1570_v40, %v776_v60  ;;  %v673_v28 = vld [vmem:[#allocation2 + $0x68] sm:$0xff] }
 0x143   : > { %v801_v10 = vadd.f32 %v1570_v40, %v778_v5  ;;  %v802_v13 = vadd.f32 %v1570_v40, %v779_v4 }
 0x144   : > { %v1599_v6 = vsel %vm813_vm0, %v799_v0, -inf  ;;  %v800_v7 = vadd.f32 %v1570_v40, %v777_v59  ;;  %v740_v11 = vpop.permute.xlu1 %739  ;;  %v735_v12 = vpop.permute.xlu0 %734 }
 0x145   : > { %838 = vmax.xlane.f32.xlu1 %v1599_v6  ;;  %v781_v14 = vmul.f32 %v740_v11, %v669_v8  ;;  %v780_v15 = vmul.f32 %v735_v12, %v668_v9  ;;  %v1608_v16 = vsel %vm813_vm0, %v801_v10, -inf  ;;  %v1619_v23 = vsel %vm813_vm0, %v802_v13, -inf }
 0x146   : > { %v1612_v17 = vsel %vm813_vm0, %v800_v7, -inf }
 0x147   : > { %v803_v20 = vadd.f32 %v1570_v40, %v780_v15  ;;  %v804_v27 = vadd.f32 %v1570_v40, %v781_v14 }
 0x148   : > { %v750_v21 = vpop.permute.xlu1 %749  ;;  %v745_v22 = vpop.permute.xlu0 %744 }
 0x149   : > { %842 = vmax.xlane.f32.xlu1 %v1608_v16  ;;  %v783_v24 = vmul.f32 %v750_v21, %v671_v18  ;;  %v782_v25 = vmul.f32 %v745_v22, %v670_v19  ;;  %v1623_v26 = vsel %vm813_vm0, %v803_v20, -inf  ;;  %v1636_v38 = vsel %vm813_vm0, %v804_v27, -inf }
 0x14b   : > { %v805_v30 = vadd.f32 %v1570_v40, %v782_v25  ;;  %v806_v33 = vadd.f32 %v1570_v40, %v783_v24 }
 0x14c   : > { %v760_v31 = vpop.permute.xlu1 %759  ;;  %v755_v32 = vpop.permute.xlu0 %754 }
 0x14d   : > { %830 = vmax.xlane.f32.xlu0 %v1577_v51  ;;  %846 = vmax.xlane.f32.xlu1 %v1623_v26  ;;  %v785_v34 = vmul.f32 %v760_v31, %v673_v28  ;;  %v784_v35 = vmul.f32 %v755_v32, %v672_v29  ;;  %v1632_v36 = vsel %vm813_vm0, %v805_v30, -inf  ;;  %v1643_v45 = vsel %vm813_vm0, %v806_v33, -inf }
 0x14f   : > { %v807_v42 = vadd.f32 %v1570_v40, %v784_v35  ;;  %v808_v49 = vadd.f32 %v1570_v40, %v785_v34 }
 0x150   : > { %v770_v43 = vpop.permute.xlu1 %769 }
 0x151   : > { %834 = vmax.xlane.f32.xlu0 %v1583_v55  ;;  %850 = vmax.xlane.f32.xlu1 %v1632_v36  ;;  %v787_v46 = vmul.f32 %v770_v43, %v675_v39  ;;  %v1647_v48 = vsel %vm813_vm0, %v807_v42, -inf  ;;  %v1659_v53 = vsel %vm813_vm0, %v808_v49, -inf }
 0x153   : > { %v810_v54 = vadd.f32 %v1570_v40, %v787_v46 }
 0x155   : > { %836 = vmax.xlane.f32.xlu0 %v1595_v3  ;;  %854 = vmax.xlane.f32.xlu1 %v1647_v48  ;;  %v1666_v56 = vsel %vm813_vm0, %v810_v54, -inf }
 0x159   : > { %840 = vmax.xlane.f32.xlu0 %v1612_v17 }
 0x15d   : > { %844 = vmax.xlane.f32.xlu0 %v1619_v23 }
 0x161   : > { %848 = vmax.xlane.f32.xlu0 %v1636_v38 }
 0x165   : > { %852 = vmax.xlane.f32.xlu0 %v1643_v45 }
 0x169   : > { %856 = vmax.xlane.f32.xlu0 %v1659_v53 }
 0x16d   : > { %860 = vmax.xlane.f32.xlu0 %v1666_v56 }
 0x1ad   : > { %v765_v44 = vpop.permute.xlu0 %764 }
 0x1ae   : > { %v786_v47 = vmul.f32 %v765_v44, %v674_v41 }
 0x1b0   : > { %v809_v50 = vadd.f32 %v1570_v40, %v786_v47 }
 0x1b2   : > { %v1655_v52 = vsel %vm813_vm0, %v809_v50, -inf }
 0x1b3   : > { %858 = vmax.xlane.f32.xlu1 %v1655_v52 }
 0x1cc   : > { %v833_v60 = vpop.xlane.xlu1 %832 }
 0x1cd   : > { %v1674_v40 = vsub.f32 %v1588_v61, %v833_v60 }
 0x1cf   : > { %v880_v37 = vmul.f32 1.442695, %v1674_v40 }
 0x1d2   : > { %v839_v1 = vpop.xlane.xlu1 %838 }
 0x1da   : > { %v831_v57 = vpop.xlane.xlu0 %830 }
 0x1db   : > { %v1670_v58 = vsub.f32 %v1577_v51, %v831_v57  ;;  %v1682_v51 = vsub.f32 %v1599_v6, %v839_v1 }
 0x1dd   : > { %v878_v59 = vmul.f32 1.442695, %v1670_v58  ;;  %v886_v61 = vmul.f32 1.442695, %v1682_v51 }
 0x1de   : > { %v835_v62 = vpop.xlane.xlu0 %834 }
 0x1df   : > { %1284 = vpow2.f32 %v878_v59  ;;  %v1677_v63 = vsub.f32 %v1583_v55, %v835_v62  ;;  %v843_v55 = vpop.xlane.xlu1 %842 }
 0x1e0   : > { %1286 = vpow2.f32 %v880_v37  ;;  %v1690_v8 = vsub.f32 %v1608_v16, %v843_v55 }
 0x1e1   : > { %v882_v0 = vmul.f32 1.442695, %v1677_v63 }
 0x1e2   : > { %v837_v2 = vpop.xlane.xlu0 %836  ;;  %v890_v10 = vmul.f32 1.442695, %v1690_v8 }
 0x1e3   : > { %v1685_v4 = vsub.f32 %v1595_v3, %v837_v2  ;;  %1288 = vpow2.f32 %v882_v0  ;;  %v847_v11 = vpop.xlane.xlu1 %846 }
 0x1e4   : > { %1290 = vpow2.f32 %v886_v61  ;;  %v1698_v13 = vsub.f32 %v1623_v26, %v847_v11 }
 0x1e5   : > { %v884_v5 = vmul.f32 1.442695, %v1685_v4 }
 0x1e6   : > { %v841_v7 = vpop.xlane.xlu0 %840  ;;  %v894_v16 = vmul.f32 1.442695, %v1698_v13 }
 0x1e7   : > { %v1693_v9 = vsub.f32 %v1612_v17, %v841_v7  ;;  %1292 = vpow2.f32 %v884_v5  ;;  %v851_v19 = vpop.xlane.xlu1 %850 }
 0x1e8   : > { %1294 = vpow2.f32 %v890_v10  ;;  %v1706_v21 = vsub.f32 %v1632_v36, %v851_v19 }
 0x1e9   : > { %v1285_v6 = vpop.eup %1284  ;;  %v888_v3 = vmul.f32 1.442695, %v1693_v9 }
 0x1ea   : > { %910 = vadd.xlane.f32.xlu1 %v1285_v6  ;;  %v845_v12 = vpop.xlane.xlu0 %844  ;;  %v1287_v15 = vpop.eup %1286  ;;  %v898_v24 = vmul.f32 1.442695, %v1706_v21 }
 0x1eb   : > { %v1701_v14 = vsub.f32 %v1619_v23, %v845_v12  ;;  %1296 = vpow2.f32 %v888_v3  ;;  %912 = vadd.xlane.f32.xlu0 %v1287_v15  ;;  %v855_v27 = vpop.xlane.xlu1 %854 }
 0x1ec   : > { %1298 = vpow2.f32 %v894_v16  ;;  %v1714_v29 = vsub.f32 %v1647_v48, %v855_v27 }
 0x1ed   : > { %v892_v17 = vmul.f32 1.442695, %v1701_v14  ;;  %v1289_v18 = vpop.eup %1288 }
 0x1ee   : > { %v849_v20 = vpop.xlane.xlu0 %848  ;;  %914 = vadd.xlane.f32.xlu1 %v1289_v18  ;;  %v1291_v23 = vpop.eup %1290  ;;  %v902_v32 = vmul.f32 1.442695, %v1714_v29 }
 0x1ef   : > { %v1709_v22 = vsub.f32 %v1636_v38, %v849_v20  ;;  %1300 = vpow2.f32 %v892_v17 }
 0x1f0   : > { %1302 = vpow2.f32 %v898_v24 }
 0x1f1   : > { %v896_v25 = vmul.f32 1.442695, %v1709_v22  ;;  %v1293_v26 = vpop.eup %1292 }
 0x1f2   : > { %v853_v28 = vpop.xlane.xlu0 %852  ;;  %918 = vadd.xlane.f32.xlu1 %v1291_v23  ;;  %916 = vadd.xlane.f32.xlu0 %v1293_v26  ;;  %v1295_v31 = vpop.eup %1294 }
 0x1f3   : > { %v1717_v30 = vsub.f32 %v1643_v45, %v853_v28  ;;  %1304 = vpow2.f32 %v896_v25 }
 0x1f4   : > { %1306 = vpow2.f32 %v902_v32 }
 0x1f5   : > { %v900_v33 = vmul.f32 1.442695, %v1717_v30  ;;  %v1297_v34 = vpop.eup %1296 }
 0x1f6   : > { %v857_v36 = vpop.xlane.xlu0 %856  ;;  %922 = vadd.xlane.f32.xlu1 %v1295_v31  ;;  %920 = vadd.xlane.f32.xlu0 %v1297_v34  ;;  %v1299_v41 = vpop.eup %1298 }
 0x1f7   : > { %v1725_v39 = vsub.f32 %v1659_v53, %v857_v36  ;;  %1308 = vpow2.f32 %v900_v33 }
 0x1f9   : > { %v904_v43 = vmul.f32 1.442695, %v1725_v39  ;;  %v1301_v44 = vpop.eup %1300 }
 0x1fa   : > { %v861_v45 = vpop.xlane.xlu0 %860  ;;  %926 = vadd.xlane.f32.xlu1 %v1299_v41  ;;  %924 = vadd.xlane.f32.xlu0 %v1301_v44  ;;  %v1303_v47 = vpop.eup %1302 }
 0x1fb   : > { %v1730_v46 = vsub.f32 %v1666_v56, %v861_v45 }
 0x1fd   : > { %v908_v48 = vmul.f32 1.442695, %v1730_v46  ;;  %v1305_v49 = vpop.eup %1304 }
 0x1fe   : > { %930 = vadd.xlane.f32.xlu1 %v1303_v47  ;;  %928 = vadd.xlane.f32.xlu0 %v1305_v49  ;;  %v1307_v50 = vpop.eup %1306 }
 0x202   : > { %934 = vadd.xlane.f32.xlu1 %v1307_v50 }
 0x240   : > { %v859_v35 = vpop.xlane.xlu1 %858 }
 0x241   : > { %v1722_v38 = vsub.f32 %v1655_v52, %v859_v35  ;;  %v1309_v52 = vpop.eup %1308 }
 0x242   : > { %932 = vadd.xlane.f32.xlu0 %v1309_v52 }
 0x243   : > { %v906_v42 = vmul.f32 1.442695, %v1722_v38 }
 0x245   : > { %1310 = vpow2.f32 %v906_v42 }
 0x246   : > { %1312 = vpow2.f32 %v904_v43 }
 0x247   : > { %1314 = vpow2.f32 %v908_v48 }
 0x24f   : > { %v1311_v53 = vpop.eup %1310 }
 0x250   : > { %v1313_v54 = vpop.eup %1312  ;;  %938 = vadd.xlane.f32.xlu1 %v1311_v53 }
 0x251   : > { %936 = vadd.xlane.f32.xlu0 %v1313_v54  ;;  %v1315_v57 = vpop.eup %1314 }
 0x255   : > { %940 = vadd.xlane.f32.xlu0 %v1315_v57 }
 0x277   : > { %v911_v56 = vpop.xlane.xlu1 %910 }
 0x278   : > { %1316 = vlog2.f32 %v911_v56  ;;  %v913_v59 = vpop.xlane.xlu0 %912 }
 0x279   : > { %1318 = vlog2.f32 %v913_v59 }
 0x27b   : > { %v915_v60 = vpop.xlane.xlu1 %914 }
 0x27c   : > { %1320 = vlog2.f32 %v915_v60 }
 0x27f   : > { %v919_v62 = vpop.xlane.xlu1 %918  ;;  %v917_v37 = vpop.xlane.xlu0 %916 }
 0x280   : > { %1322 = vlog2.f32 %v919_v62 }
 0x281   : > { %1324 = vlog2.f32 %v917_v37 }
 0x282   : > { %v1317_v0 = vpop.eup %1316 }
 0x283   : > { %v943_v1 = vmul.f32 0.6931472, %v1317_v0  ;;  %v923_v2 = vpop.xlane.xlu1 %922  ;;  %v921_v61 = vpop.xlane.xlu0 %920 }
 0x284   : > { %1326 = vlog2.f32 %v923_v2  ;;  %v1319_v55 = vpop.eup %1318 }
 0x285   : > { %v974_v5 = vsub.f32 %v1670_v58, %v943_v1  ;;  %1328 = vlog2.f32 %v921_v61  ;;  %v945_v6 = vmul.f32 0.6931472, %v1319_v55 }
 0x286   : > { %v1321_v7 = vpop.eup %1320 }
 0x287   : > { %990 = vst [vmem:[%s1527_s9] sm:$0xff] %v974_v5  ;;  %v947_v10 = vmul.f32 0.6931472, %v1321_v7  ;;  %v927_v3 = vpop.xlane.xlu1 %926  ;;  %v925_v11 = vpop.xlane.xlu0 %924  ;;  %v975_v12 = vsub.f32 %v1674_v40, %v945_v6 }
 0x288   : > { %1330 = vlog2.f32 %v927_v3 }
 0x289   : > { %v976_v15 = vsub.f32 %v1677_v63, %v947_v10  ;;  %1332 = vlog2.f32 %v925_v11  ;;  %991 = vst [vmem:[%s1527_s9 + $0x8] sm:$0xff] %v975_v12 }
 0x28a   : > { %v1323_v16 = vpop.eup %1322 }
 0x28b   : > { %v1325_v58 = vpop.eup %1324  ;;  %992 = vst [vmem:[%s1527_s9 + $0x10] sm:$0xff] %v976_v15  ;;  %v951_v17 = vmul.f32 0.6931472, %v1323_v16  ;;  %v931_v18 = vpop.xlane.xlu1 %930 }
 0x28c   : > { %v929_v19 = vpop.xlane.xlu0 %928  ;;  %v949_v20 = vmul.f32 0.6931472, %v1325_v58  ;;  %1334 = vlog2.f32 %v931_v18 }
 0x28d   : > { %v978_v23 = vsub.f32 %v1682_v51, %v951_v17  ;;  %1336 = vlog2.f32 %v929_v19 }
 0x28e   : > { %v1327_v40 = vpop.eup %1326  ;;  %v977_v24 = vsub.f32 %v1685_v4, %v949_v20 }
 0x28f   : > { %v1329_v63 = vpop.eup %1328  ;;  %994 = vst [vmem:[%s1527_s9 + $0x20] sm:$0xff] %v978_v23  ;;  %v955_v25 = vmul.f32 0.6931472, %v1327_v40  ;;  %v935_v26 = vpop.xlane.xlu1 %934 }
 0x290   : > { %993 = vst [vmem:[%s1527_s9 + $0x18] sm:$0xff] %v977_v24  ;;  %v953_v28 = vmul.f32 0.6931472, %v1329_v63  ;;  %1338 = vlog2.f32 %v935_v26 }
 0x291   : > { %v980_v31 = vsub.f32 %v1690_v8, %v955_v25 }
 0x292   : > { %v1331_v32 = vpop.eup %1330  ;;  %v979_v51 = vsub.f32 %v1693_v9, %v953_v28 }
 0x293   : > { %v1333_v33 = vpop.eup %1332  ;;  %996 = vst [vmem:[%s1527_s9 + $0x30] sm:$0xff] %v980_v31  ;;  %v959_v4 = vmul.f32 0.6931472, %v1331_v32 }
 0x294   : > { %995 = vst [vmem:[%s1527_s9 + $0x28] sm:$0xff] %v979_v51  ;;  %v957_v36 = vmul.f32 0.6931472, %v1333_v33 }
 0x295   : > { %v982_v41 = vsub.f32 %v1698_v13, %v959_v4 }
 0x296   : > { %v1335_v8 = vpop.eup %1334  ;;  %v981_v42 = vsub.f32 %v1701_v14, %v957_v36 }
 0x297   : > { %v1337_v43 = vpop.eup %1336  ;;  %998 = vst [vmem:[%s1527_s9 + $0x40] sm:$0xff] %v982_v41  ;;  %v963_v9 = vmul.f32 0.6931472, %v1335_v8 }
 0x298   : > { %997 = vst [vmem:[%s1527_s9 + $0x38] sm:$0xff] %v981_v42  ;;  %v961_v45 = vmul.f32 0.6931472, %v1337_v43 }
 0x299   : > { %v984_v47 = vsub.f32 %v1706_v21, %v963_v9 }
 0x29a   : > { %v1339_v48 = vpop.eup %1338  ;;  %v983_v49 = vsub.f32 %v1709_v22, %v961_v45 }
 0x29b   : > { %1000 = vst [vmem:[%s1527_s9 + $0x50] sm:$0xff] %v984_v47  ;;  %v967_v50 = vmul.f32 0.6931472, %v1339_v48 }
 0x29c   : > { %999 = vst [vmem:[%s1527_s9 + $0x48] sm:$0xff] %v983_v49 }
 0x29d   : > { %v986_v52 = vsub.f32 %v1714_v29, %v967_v50 }
 0x29f   : > { %1002 = vst [vmem:[%s1527_s9 + $0x60] sm:$0xff] %v986_v52 }
 0x2cf   : > { %v933_v27 = vpop.xlane.xlu0 %932 }
 0x2d0   : > { %1340 = vlog2.f32 %v933_v27 }
 0x2da   : > { %v1341_v13 = vpop.eup %1340 }
 0x2db   : > { %v965_v14 = vmul.f32 0.6931472, %v1341_v13 }
 0x2dd   : > { %v939_v34 = vpop.xlane.xlu1 %938  ;;  %v985_v54 = vsub.f32 %v1717_v30, %v965_v14 }
 0x2de   : > { %v937_v35 = vpop.xlane.xlu0 %936  ;;  %1342 = vlog2.f32 %v939_v34 }
 0x2df   : > { %1344 = vlog2.f32 %v937_v35  ;;  %1001 = vst [vmem:[%s1527_s9 + $0x58] sm:$0xff] %v985_v54 }
 0x2e2   : > { %v941_v44 = vpop.xlane.xlu0 %940 }
 0x2e3   : > { %1346 = vlog2.f32 %v941_v44 }
 0x2e8   : > { %v1343_v53 = vpop.eup %1342 }
 0x2e9   : > { %v1345_v57 = vpop.eup %1344  ;;  %v971_v56 = vmul.f32 0.6931472, %v1343_v53 }
 0x2ea   : > { %v969_v21 = vmul.f32 0.6931472, %v1345_v57 }
 0x2eb   : > { %v988_v22 = vsub.f32 %v1722_v38, %v971_v56 }
 0x2ec   : > { %v987_v60 = vsub.f32 %v1725_v39, %v969_v21 }
 0x2ed   : > { %v1347_v59 = vpop.eup %1346  ;;  %1004 = vst [vmem:[%s1527_s9 + $0x70] sm:$0xff] %v988_v22 }
 0x2ee   : > { %v973_v62 = vmul.f32 0.6931472, %v1347_v59  ;;  %1003 = vst [vmem:[%s1527_s9 + $0x68] sm:$0xff] %v987_v60 }
 0x2f0   : > { %v989_v37 = vsub.f32 %v1730_v46, %v973_v62 }
 0x2f2   : > { %1005 = vst [vmem:[%s1527_s9 + $0x78] sm:$0xff] %v989_v37 }
 0x2f3 PF: > { %s14_s21 = sadd.s32 1, %s1402_s21   ;;  %s1791_s15 = smov %s1382_s16 }
 0x2f4   : > { %p11_p0 = scmp.ge.s32.totalorder %s14_s21, 11   ;;  %s1792_s16 = smov %s1482_s28 }
 0x2f5   : > { %s1793_s17 = smov %s1394_s19  ;;  %s1794_s18 = smov %s1398_s20 }
 0x2f6   : > { %s1795_s19 = smov %s1798_s22  ;;  %s1796_s20 = smov %s1802_s23 }
 0x2f7   :  { %13 = sbr.rel (!%p11_p0) target bundleno = 4 (0x4), region = 126 }

// kernel: gcn_net_forward.2
= control target key start
LH: loop header
LB: loop body
LE: loop exit
PB: predicated region body
PF: predicated region fallthrough
CT: control target
= control target key end

     0   :  { %s1204_s15 = smov 0   ;;  %s1206_s16 = smov 0   ;;  %s1389_s0 = inlined_call_operand.vmem [shape: bf16[384,384], index: 0, kind: input, shape index: {}]   ;;  %s1390_s1 = inlined_call_operand.vmem [shape: bf16[384,128], index: 1, kind: input, shape index: {}]   ;;  %s1391_s2 = inlined_call_operand.vmem [shape: f32[1,128], index: 2, kind: input, shape index: {}]   ;;  %s1392_s3 = inlined_call_operand.vmem [shape: f32[384,1], index: 3, kind: input, shape index: {}]   ;;  %s1393_s4 = inlined_call_operand.vmem [shape: bf16[384,128], index: 4, kind: output, shape index: {}]  }
   0x1   :  { %s1208_s17 = smov 0   ;;  %s1210_s18 = smov 0  }
   0x2   :  { %s1212_s19 = smov 0   ;;  %s1214_s20 = smov 0  }
   0x3   :  { %s1216_s21 = smov 0  }
   0x4 LB: > { %s23_s22 = sadd.s32 1, %s1167_s19  ;;  %s26_s23 = sadd.s32 1, %s1171_s20  ;;  %s1175_s21 = sphi %s1216_s21, %s14_s21   ;;  %s1171_s20 = sphi %s1214_s20, %s1399_s20   ;;  %s1167_s19 = sphi %s1212_s19, %s1398_s19   ;;  %s1163_s18 = sphi %s1210_s18, %s1397_s18   ;;  %s1159_s17 = sphi %s1208_s17, %s1396_s17   ;;  %s1155_s16 = sphi %s1206_s16, %s1395_s16   ;;  %s1151_s15 = sphi %s1204_s15, %s1394_s15  }
   0x5   : > { %p24_p0 = scmp.ge.s32.totalorder %s23_s22, 3  ;;  %p42_p1 = scmp.ne.s32.totalorder %s1155_s16, %s1151_s15 }
   0x6   : > { %p43_p2 = scmp.eq.s32.totalorder %s1175_s21, 0  ;;  %s35_s27 = sadd.s32 1, %s1155_s16 }
   0x7   : > { %s1401_s22 = smov (%p24_p0, %s23_s22), 0  ;;  %s1403_s23 = smov (!%p24_p0, %s26_s23), %s1171_s20 }
   0x8   : > { %p44_p3 = por %p43_p2, %p42_p1  ;;  %p28_p4 = scmp.ge.s32.totalorder %s1403_s23, 3 }
   0x9   : > { %s31_s24 = ssub.s32 %s1167_s19, %s1401_s22  ;;  %p946_p6 = scmp.ge.s32.totalorder %s1175_s21, 9 }
   0xa   : > { %s1405_s23 = smov (%p28_p4, %s1403_s23), 0 }
   0xb   : > { %s30_s25 = ssub.s32 %s1171_s20, %s1405_s23  ;;  %170 = sbr.rel (%p946_p6) target bundleno = 35 (0x23), region = 20 }
   0xc   : > { %s32_s26 = sor.u32 %s31_s24, %s30_s25 }
   0xd   : > { %p33_p5 = scmp.eq.s32.totalorder %s32_s26, 0 }
   0xf   : > { %s1255_s28 = scalar_select %p33_p5, %s1155_s16, %s35_s27  }
  0x12   : > { %173 = sbr.rel (!%p44_p3) target bundleno = 35 (0x23), region = 24  ;;  %s175_s29 = sand.u32 (%p44_p3), 1, %s1155_s16  }
  0x13   : > { %s1044_s30 = smul.u32 (%p44_p3), 48, %s1171_s20  ;;  %s947_s5 = sshll.u32 (%p44_p3), %s175_s29, 6 }
  0x14   : > { %s177_s11 = scalar_lea.vmem (%p44_p3), [#allocation3], %s947_s5 }
  0x15   : > { %s180_s6 = sadd.s32 (%p44_p3), %s1167_s19, %s1044_s30 }
  0x16   : > { %s950_s7 = sshll.u32 (%p44_p3), %s180_s6, 2 }
  0x17   : > { %s1264_s10 = scalar_lea.vmem (%p44_p3), %s1389_s0, %s950_s7 }
  0x18   : > { %v198_v0 = vld [vmem:[%s1264_s10] sm:$0xf] (%p44_p3)  ;;  %v200_v1 = vld [vmem:[%s1264_s10 + $0xc] sm:$0xf] (%p44_p3)  ;;  %v202_v2 = vld [vmem:[%s1264_s10 + $0x18] sm:$0xf] (%p44_p3) }
  0x19   : > { %199 = vst [vmem:[%s177_s11] sm:$0xf] %v198_v0  ;;  %201 = vst [vmem:[%s177_s11 + $0x4] sm:$0xf] %v200_v1  ;;  %v204_v3 = vld [vmem:[%s1264_s10 + $0x24] sm:$0xf] }
  0x1a   : > { %203 = vst [vmem:[%s177_s11 + $0x8] sm:$0xf] %v202_v2  ;;  %v206_v4 = vld [vmem:[%s1264_s10 + $0x30] sm:$0xf]  ;;  %v208_v5 = vld [vmem:[%s1264_s10 + $0x3c] sm:$0xf] }
  0x1b   : > { %205 = vst [vmem:[%s177_s11 + $0xc] sm:$0xf] %v204_v3  ;;  %207 = vst [vmem:[%s177_s11 + $0x10] sm:$0xf] %v206_v4  ;;  %v210_v6 = vld [vmem:[%s1264_s10 + $0x48] sm:$0xf] }
  0x1c   : > { %209 = vst [vmem:[%s177_s11 + $0x14] sm:$0xf] %v208_v5  ;;  %v212_v7 = vld [vmem:[%s1264_s10 + $0x54] sm:$0xf]  ;;  %v214_v8 = vld [vmem:[%s1264_s10 + $0x60] sm:$0xf] }
  0x1d   : > { %211 = vst [vmem:[%s177_s11 + $0x18] sm:$0xf] %v210_v6  ;;  %213 = vst [vmem:[%s177_s11 + $0x1c] sm:$0xf] %v212_v7  ;;  %v216_v9 = vld [vmem:[%s1264_s10 + $0x6c] sm:$0xf] }
  0x1e   : > { %215 = vst [vmem:[%s177_s11 + $0x20] sm:$0xf] %v214_v8  ;;  %v218_v10 = vld [vmem:[%s1264_s10 + $0x78] sm:$0xf]  ;;  %v220_v11 = vld [vmem:[%s1264_s10 + $0x84] sm:$0xf] }
  0x1f   : > { %217 = vst [vmem:[%s177_s11 + $0x24] sm:$0xf] %v216_v9  ;;  %219 = vst [vmem:[%s177_s11 + $0x28] sm:$0xf] %v218_v10  ;;  %v222_v12 = vld [vmem:[%s1264_s10 + $0x90] sm:$0xf] }
  0x20   : > { %221 = vst [vmem:[%s177_s11 + $0x2c] sm:$0xf] %v220_v11  ;;  %v224_v13 = vld [vmem:[%s1264_s10 + $0x9c] sm:$0xf]  ;;  %v226_v14 = vld [vmem:[%s1264_s10 + $0xa8] sm:$0xf] }
  0x21   : > { %223 = vst [vmem:[%s177_s11 + $0x30] sm:$0xf] %v222_v12  ;;  %225 = vst [vmem:[%s177_s11 + $0x34] sm:$0xf] %v224_v13  ;;  %v228_v15 = vld [vmem:[%s1264_s10 + $0xb4] sm:$0xf] }
  0x22   : > { %227 = vst [vmem:[%s177_s11 + $0x38] sm:$0xf] %v226_v14  ;;  %229 = vst [vmem:[%s177_s11 + $0x3c] sm:$0xf] %v228_v15 }
  0x23 PF: > { %p951_p7 = scmp.ge.s32.totalorder %s1175_s21, 1  ;;  %p301_p8 = scmp.lt.s32.totalorder %s1175_s21, 10 }
  0x25   : > { %p302_p9 = pnand %p951_p7, %p301_p8 }
  0x26   : > { %s308_s12 = sand.u32 (!%p302_p9), 1, %s1151_s15   ;;  %s953_s13 = sshll.u32 (!%p302_p9), %s1159_s17, 4 }
  0x27   : > { %305 = sbr.rel (%p302_p9) target bundleno = 440 (0x1b8), region = 73  ;;  %s952_s14 = sshll.u32 (!%p302_p9), %s308_s12, 6 }
  0x28   : > { %p345_p10 = scmp.lt.s32.totalorder (!%p302_p9), %s953_s13, 47  ;;  %s955_s24 = sshll.u32 (!%p302_p9), %s1163_s18, 4 }
  0x29   : > { %p351_p11 = scmp.lt.s32.totalorder (!%p302_p9), %s955_s24, 47  ;;  %s957_s25 = sshll.u32 (!%p302_p9), %s1163_s18, 3 }
  0x2a   : > { %p357_p12 = scmp.lt.s32.totalorder (!%p302_p9), %s957_s25, 23  ;;  %s1303_s11 = scalar_lea.vmem (!%p302_p9), [#allocation3], %s952_s14 }
  0x2b   : > { %p959_p13 = scmp.ne.s32.totalorder (!%p302_p9), %s1159_s17, 0 }
  0x2e   : > { %s1407_s13 = smov (!%p345_p10, %s953_s13), 47  ;;  %s1409_s24 = smov (!%p351_p11, %s955_s24), 47 }
  0x2f   : > { %s954_s26 = sshll.u32 %s1407_s13, 2  ;;  %s1411_s25 = smov (!%p357_p12, %s957_s25), 23  ;;  %v1177_v16 = vmov (!%p959_p13), 0.0  }
  0x30   : > { %s1291_s30 = scalar_lea.vmem %s1390_s1, %s954_s26  ;;  %s956_s5 = sshll.u32 %s1409_s24, 3  ;;  %367 = vst [vmem:[#allocation2] sm:$0xff] (!%p959_p13), %v1177_v16  ;;  %368 = vst [vmem:[#allocation2 + $0x8] sm:$0xff] (!%p959_p13), %v1177_v16 }
  0x31   : > { %s1296_s15 = scalar_lea.vmem %s1392_s3, %s956_s5  ;;  %s958_s8 = sshll.u32 %s1411_s25, 3  ;;  %369 = vst [vmem:[#allocation2 + $0x10] sm:$0xff] (!%p959_p13), %v1177_v16  ;;  %370 = vst [vmem:[#allocation2 + $0x18] sm:$0xff] (!%p959_p13), %v1177_v16 }
  0x32   : > { %s1301_s18 = scalar_lea.vmem %s1393_s4, %s958_s8  ;;  %366 = sbr.rel (%p959_p13) target bundleno = 57 (0x39), region = 81  ;;  %371 = vst [vmem:[#allocation2 + $0x20] sm:$0xff] (!%p959_p13), %v1177_v16  ;;  %372 = vst [vmem:[#allocation2 + $0x28] sm:$0xff] (!%p959_p13), %v1177_v16 }
  0x33   : > { %373 = vst [vmem:[#allocation2 + $0x30] sm:$0xff] (!%p959_p13), %v1177_v16  ;;  %374 = vst [vmem:[#allocation2 + $0x38] sm:$0xff] (!%p959_p13), %v1177_v16 }
  0x34   : > { %375 = vst [vmem:[#allocation2 + $0x40] sm:$0xff] (!%p959_p13), %v1177_v16  ;;  %376 = vst [vmem:[#allocation2 + $0x48] sm:$0xff] (!%p959_p13), %v1177_v16 }
  0x35   : > { %377 = vst [vmem:[#allocation2 + $0x50] sm:$0xff] (!%p959_p13), %v1177_v16  ;;  %378 = vst [vmem:[#allocation2 + $0x58] sm:$0xff] (!%p959_p13), %v1177_v16 }
  0x36   : > { %379 = vst [vmem:[#allocation2 + $0x60] sm:$0xff] (!%p959_p13), %v1177_v16  ;;  %380 = vst [vmem:[#allocation2 + $0x68] sm:$0xff] (!%p959_p13), %v1177_v16 }
  0x37   : > { %381 = vst [vmem:[#allocation2 + $0x70] sm:$0xff] (!%p959_p13), %v1177_v16  ;;  %382 = vst [vmem:[#allocation2 + $0x78] sm:$0xff] (!%p959_p13), %v1177_v16 }
  0x39 PF: > { %v1103_v17 = vld [vmem:[%s1291_s30] sm:$0xff]   ;;  %v1104_v18 = vld [vmem:[%s1291_s30 + $0x8] sm:$0xff]   ;;  %v1105_v19 = vld [vmem:[%s1291_s30 + $0x10] sm:$0xff]   ;;  %p976_p0 = scmp.ne.s32.totalorder %s1159_s17, 2 }
  0x3a   : > { %996 = vmatprep.subr.bf16.mxu0 %v1103_v17  ;;  %1028 = vmatprep.subr.bf16.mxu1 %v1103_v17  ;;  %v1106_v20 = vld [vmem:[%s1291_s30 + $0x18] sm:$0xff]   ;;  %v1111_v21 = vld [vmem:[%s1303_s11] sm:$0xff]   ;;  %v1108_v24 = vld [vmem:[%s1291_s30 + $0x28] sm:$0xff]  }
  0x3b   : > { %997 = vmatpush3.bf16.msra.mxu0 %v1103_v17  ;;  %1036 = vmatpush3.bf16.msra.mxu1 %v1103_v17  ;;  %v1112_v22 = vld [vmem:[%s1303_s11 + $0x20] sm:$0xff]   ;;  %v1109_v25 = vld [vmem:[%s1291_s30 + $0x30] sm:$0xff]   ;;  %v1110_v26 = vld [vmem:[%s1291_s30 + $0x38] sm:$0xff]  }
  0x3c   : > { %998 = vmatprep.subr.bf16.mxu0 %v1104_v18  ;;  %1029 = vmatprep.subr.bf16.mxu1 %v1104_v18  ;;  %v1107_v23 = vld [vmem:[%s1291_s30 + $0x20] sm:$0xff]   ;;  %v1113_v27 = vld [vmem:[%s1303_s11 + $0x8] sm:$0xff]   ;;  %v1115_v29 = vld [vmem:[%s1303_s11 + $0x10] sm:$0xff]  }
  0x3d   : > { %1012 = vmatprep.mubr.bf16.mxu0 %v1111_v21  ;;  %1020 = vmatprep.mubr.bf16.mxu1 %v1112_v22  ;;  %v1114_v28 = vld [vmem:[%s1303_s11 + $0x28] sm:$0xff]   ;;  %v1116_v30 = vld [vmem:[%s1303_s11 + $0x30] sm:$0xff]   ;;  %v1117_v31 = vld [vmem:[%s1303_s11 + $0x18] sm:$0xff]  }
  0x3e   : > { %v1118_v32 = vld [vmem:[%s1303_s11 + $0x38] sm:$0xff]   ;;  %v385_v33 = vld [vmem:[#allocation2 + $0x10] sm:$0xff]  ;;  %v383_v35 = vld [vmem:[#allocation2] sm:$0xff] }
  0x3f   : > { %999 = vmatpush3.bf16.msra.mxu0 %v1104_v18  ;;  %1037 = vmatpush3.bf16.msra.mxu1 %v1104_v18  ;;  %v393_v34 = vld [vmem:[#allocation2 + $0x50] sm:$0xff]  ;;  %v391_v36 = vld [vmem:[#allocation2 + $0x40] sm:$0xff]  ;;  %v386_v39 = vld [vmem:[#allocation2 + $0x18] sm:$0xff] }
  0x40   : > { %1000 = vmatprep.subr.bf16.mxu0 %v1105_v19  ;;  %1030 = vmatprep.subr.bf16.mxu1 %v1105_v19  ;;  %v394_v40 = vld [vmem:[#allocation2 + $0x58] sm:$0xff]  ;;  %v384_v45 = vld [vmem:[#allocation2 + $0x8] sm:$0xff]  ;;  %v389_v57 = vld [vmem:[#allocation2 + $0x30] sm:$0xff] }
  0x41   : > { %v392_v46 = vld [vmem:[#allocation2 + $0x48] sm:$0xff]  ;;  %v397_v58 = vld [vmem:[#allocation2 + $0x70] sm:$0xff]  ;;  %v387_v59 = vld [vmem:[#allocation2 + $0x20] sm:$0xff] }
  0x42   : > { %v395_v60 = vld [vmem:[#allocation2 + $0x60] sm:$0xff]  ;;  %v390_v63 = vld [vmem:[#allocation2 + $0x38] sm:$0xff]  ;;  %v388_v5 = vld [vmem:[#allocation2 + $0x28] sm:$0xff] }
  0x43   : > { %1001 = vmatpush3.bf16.msra.mxu0 %v1105_v19  ;;  %1038 = vmatpush3.bf16.msra.mxu1 %v1105_v19  ;;  %v398_v0 = vld [vmem:[#allocation2 + $0x78] sm:$0xff]  ;;  %v396_v6 = vld [vmem:[#allocation2 + $0x68] sm:$0xff]  ;;  %v678_v17 = vld [vmem:[%s1296_s15 + $0x10] sm:$0xff] (!%p976_p0)  ;;  %v1178_v19 = vmov (!%p976_p0), 0  }
  0x44   : > { %1002 = vmatprep.subr.bf16.mxu0 %v1106_v20  ;;  %1031 = vmatprep.subr.bf16.mxu1 %v1106_v20  ;;  %v676_v18 = vld [vmem:[%s1296_s15] sm:$0xff] (!%p976_p0)  ;;  %v677_v21 = vld [vmem:[%s1296_s15 + $0x8] sm:$0xff] (!%p976_p0) }
  0x45   : > { %1120 = vset.pattern.permute.xlu1 (!%p976_p0), %v1178_v19  ;;  %1119 = vset.pattern.permute.xlu0 (!%p976_p0), %v1178_v19  ;;  %v681_v22 = vld [vmem:[%s1296_s15 + $0x28] sm:$0xff] (!%p976_p0) }
  0x46   : > { %704 = vperm.xlu1 (!%p976_p0), %1120, %v678_v17   ;;  %694 = vperm.xlu0 (!%p976_p0), %1119, %v676_v18  }
  0x47   : > { %1003 = vmatpush3.bf16.msra.mxu0 %v1106_v20  ;;  %1039 = vmatpush3.bf16.msra.mxu1 %v1106_v20  ;;  %v679_v20 = vld [vmem:[%s1296_s15 + $0x18] sm:$0xff] (!%p976_p0) }
  0x48   : > { %1004 = vmatprep.subr.bf16.mxu0 %v1107_v23  ;;  %1032 = vmatprep.subr.bf16.mxu1 %v1107_v23 }
  0x4a   : > { %709 = vperm.xlu1 (!%p976_p0), %1120, %v679_v20   ;;  %699 = vperm.xlu0 (!%p976_p0), %1119, %v677_v21  }
  0x4b   : > { %1005 = vmatpush3.bf16.msra.mxu0 %v1107_v23  ;;  %1040 = vmatpush3.bf16.msra.mxu1 %v1107_v23  ;;  %v680_v23 = vld [vmem:[%s1296_s15 + $0x20] sm:$0xff] (!%p976_p0) }
  0x4c   : > { %1006 = vmatprep.subr.bf16.mxu0 %v1108_v24  ;;  %1033 = vmatprep.subr.bf16.mxu1 %v1108_v24 }
  0x4e   : > { %719 = vperm.xlu1 (!%p976_p0), %1120, %v681_v22   ;;  %714 = vperm.xlu0 (!%p976_p0), %1119, %v680_v23  }
  0x4f   : > { %1007 = vmatpush3.bf16.msra.mxu0 %v1108_v24  ;;  %1041 = vmatpush3.bf16.msra.mxu1 %v1108_v24  ;;  %v683_v24 = vld [vmem:[%s1296_s15 + $0x38] sm:$0xff] (!%p976_p0) }
  0x50   : > { %1008 = vmatprep.subr.bf16.mxu0 %v1109_v25  ;;  %1034 = vmatprep.subr.bf16.mxu1 %v1109_v25 }
  0x52   : > { %729 = vperm.xlu1 (!%p976_p0), %1120, %v683_v24  }
  0x53   : > { %1009 = vmatpush3.bf16.msra.mxu0 %v1109_v25  ;;  %1042 = vmatpush3.bf16.msra.mxu1 %v1109_v25  ;;  %v682_v25 = vld [vmem:[%s1296_s15 + $0x30] sm:$0xff] (!%p976_p0) }
  0x54   : > { %1010 = vmatprep.subr.bf16.mxu0 %v1110_v26  ;;  %1035 = vmatprep.subr.bf16.mxu1 %v1110_v26 }
  0x55   : > { %724 = vperm.xlu0 (!%p976_p0), %1119, %v682_v25  }
  0x57   : > { %1011 = vmatpush3.bf16.msra.mxu0 %v1110_v26  ;;  %1043 = vmatpush3.bf16.msra.mxu1 %v1110_v26  ;;  %v685_v26 = vld [vmem:[%s1296_s15 + $0x48] sm:$0xff] (!%p976_p0) }
  0x58   : > { %739 = vperm.xlu1 (!%p976_p0), %1120, %v685_v26  }
  0x5a   : > { %1013 = vmatmul.mubr.bf16.vlgmr.msra.gmra.mrb[0].mxu0 %v1113_v27  ;;  %1021 = vmatmul.mubr.bf16.vlgmr.msra.gmra.mrb[0].mxu1 %v1114_v28  ;;  %v684_v27 = vld [vmem:[%s1296_s15 + $0x40] sm:$0xff] (!%p976_p0)  ;;  %v687_v28 = vld [vmem:[%s1296_s15 + $0x58] sm:$0xff] (!%p976_p0) }
  0x5b   : > { %1016 = vmatprep.mubr.bf16.mxu0 %v1115_v29  ;;  %1024 = vmatprep.mubr.bf16.mxu1 %v1116_v30  ;;  %v686_v29 = vld [vmem:[%s1296_s15 + $0x50] sm:$0xff] (!%p976_p0)  ;;  %v689_v30 = vld [vmem:[%s1296_s15 + $0x68] sm:$0xff] (!%p976_p0) }
  0x5c   : > { %734 = vperm.xlu0 (!%p976_p0), %1119, %v684_v27   ;;  %749 = vperm.xlu1 (!%p976_p0), %1120, %v687_v28  }
  0x60   : > { %744 = vperm.xlu0 (!%p976_p0), %1119, %v686_v29   ;;  %759 = vperm.xlu1 (!%p976_p0), %1120, %v689_v30  }
  0x62   : > { %1017 = vmatmul.mubr.bf16.gmra.mrb[4].mxu0 %v1117_v31  ;;  %1025 = vmatmul.mubr.bf16.gmra.mrb[4].mxu1 %v1118_v32  ;;  %v688_v31 = vld [vmem:[%s1296_s15 + $0x60] sm:$0xff] (!%p976_p0)  ;;  %v691_v32 = vld [vmem:[%s1296_s15 + $0x78] sm:$0xff] (!%p976_p0) }
  0x64   : > { %754 = vperm.xlu0 (!%p976_p0), %1119, %v688_v31   ;;  %769 = vperm.xlu1 (!%p976_p0), %1120, %v691_v32  }
 0x12d   : > { %v1014_v37 = vpop.f32.mrb[0].mxu0  ;;  %v1022_v38 = vpop.f32.mrb[0].mxu1 }
 0x12e   : > { %v626_v41 = vadd.f32 %v1014_v37, %v385_v33  ;;  %v634_v42 = vadd.f32 %v1022_v38, %v393_v34  ;;  %v561_v43 = vpop.f32.mrb[1].mxu0  ;;  %v593_v44 = vpop.f32.mrb[1].mxu1  ;;  %v690_v33 = vld [vmem:[%s1296_s15 + $0x70] sm:$0xff] (!%p976_p0)  ;;  %v1342_v38 = vld [vmem:[%s1391_s2] ss:$0 sm:$0xff] (!%p976_p0) }
 0x12f   : > { %v624_v47 = vadd.f32 %v561_v43, %v383_v35  ;;  %v632_v48 = vadd.f32 %v593_v44, %v391_v36  ;;  %v1015_v49 = vpop.f32.mrb[2].mxu0  ;;  %v1023_v50 = vpop.f32.mrb[2].mxu1  ;;  %764 = vperm.xlu0 (!%p976_p0), %1119, %v690_v33  }
 0x130   : > { %642 = vst [vmem:[#allocation2 + $0x10] sm:$0xff] %v626_v41  ;;  %650 = vst [vmem:[#allocation2 + $0x50] sm:$0xff] %v634_v42  ;;  %v627_v51 = vadd.f32 %v1015_v49, %v386_v39  ;;  %v635_v52 = vadd.f32 %v1023_v50, %v394_v40  ;;  %v564_v53 = vpop.f32.mrb[3].mxu0  ;;  %v596_v54 = vpop.f32.mrb[3].mxu1 }
 0x131   : > { %640 = vst [vmem:[#allocation2] sm:$0xff] %v624_v47  ;;  %648 = vst [vmem:[#allocation2 + $0x40] sm:$0xff] %v632_v48  ;;  %v625_v55 = vadd.f32 %v564_v53, %v384_v45  ;;  %v633_v56 = vadd.f32 %v596_v54, %v392_v46  ;;  %v705_v36 = vpop.permute.xlu1 (!%p976_p0), %704  ;;  %v695_v37 = vpop.permute.xlu0 (!%p976_p0), %694 }
 0x132   : > { %643 = vst [vmem:[#allocation2 + $0x18] sm:$0xff] %v627_v51  ;;  %651 = vst [vmem:[#allocation2 + $0x58] sm:$0xff] %v635_v52 }
 0x133   : > { %641 = vst [vmem:[#allocation2 + $0x8] sm:$0xff] %v625_v55  ;;  %649 = vst [vmem:[#allocation2 + $0x48] sm:$0xff] %v633_v56 }
 0x135   : > { %v1018_v61 = vpop.f32.mrb[4].mxu0  ;;  %v1026_v62 = vpop.f32.mrb[4].mxu1  ;;  %659 = sbr.rel (%p976_p0) target bundleno = 440 (0x1b8), region = 85 }
 0x136   : > { %v630_v1 = vadd.f32 %v1018_v61, %v389_v57  ;;  %v638_v2 = vadd.f32 %v1026_v62, %v397_v58  ;;  %v577_v3 = vpop.f32.mrb[5].mxu0  ;;  %v609_v4 = vpop.f32.mrb[5].mxu1 }
 0x137   : > { %v628_v7 = vadd.f32 %v577_v3, %v387_v59  ;;  %v636_v8 = vadd.f32 %v609_v4, %v395_v60  ;;  %v1019_v9 = vpop.f32.mrb[6].mxu0  ;;  %v1027_v10 = vpop.f32.mrb[6].mxu1  ;;  %v662_v34 = vld [vmem:[#allocation2 + $0x10] sm:$0xff] (!%p976_p0) }
 0x138   : > { %646 = vst [vmem:[#allocation2 + $0x30] sm:$0xff] %v630_v1  ;;  %654 = vst [vmem:[#allocation2 + $0x70] sm:$0xff] %v638_v2  ;;  %v631_v11 = vadd.f32 %v1019_v9, %v390_v63  ;;  %v639_v12 = vadd.f32 %v1027_v10, %v398_v0  ;;  %v580_v13 = vpop.f32.mrb[7].mxu0  ;;  %v612_v14 = vpop.f32.mrb[7].mxu1  ;;  %v660_v35 = vld [vmem:[#allocation2] sm:$0xff] (!%p976_p0)  ;;  %v774_v39 = vmul.f32 (!%p976_p0), %v705_v36, %v662_v34  ;;  %v670_v21 = vld [vmem:[#allocation2 + $0x50] sm:$0xff] (!%p976_p0) }
 0x139   : > { %644 = vst [vmem:[#allocation2 + $0x20] sm:$0xff] %v628_v7  ;;  %652 = vst [vmem:[#allocation2 + $0x60] sm:$0xff] %v636_v8  ;;  %v629_v15 = vadd.f32 %v580_v13, %v388_v5  ;;  %v637_v16 = vadd.f32 %v612_v14, %v396_v6  ;;  %v772_v40 = vmul.f32 (!%p976_p0), %v695_v37, %v660_v35  ;;  %v663_v41 = vld [vmem:[#allocation2 + $0x18] sm:$0xff] (!%p976_p0)  ;;  %v710_v45 = vpop.permute.xlu1 (!%p976_p0), %709  ;;  %v700_v46 = vpop.permute.xlu0 (!%p976_p0), %699  ;;  %v668_v10 = vld [vmem:[#allocation2 + $0x40] sm:$0xff] (!%p976_p0) }
 0x13a   : > { %647 = vst [vmem:[#allocation2 + $0x38] sm:$0xff] %v631_v11  ;;  %655 = vst [vmem:[#allocation2 + $0x78] sm:$0xff] %v639_v12  ;;  %v661_v42 = vld [vmem:[#allocation2 + $0x8] sm:$0xff] (!%p976_p0)  ;;  %v797_v43 = vadd.f32 (!%p976_p0), %v1342_v38, %v774_v39  ;;  %v775_v47 = vmul.f32 (!%p976_p0), %v710_v45, %v663_v41  ;;  %v671_v20 = vld [vmem:[#allocation2 + $0x58] sm:$0xff] (!%p976_p0) }
 0x13b   : > { %645 = vst [vmem:[#allocation2 + $0x28] sm:$0xff] %v629_v15  ;;  %653 = vst [vmem:[#allocation2 + $0x68] sm:$0xff] %v637_v16  ;;  %v795_v44 = vadd.f32 (!%p976_p0), %v1342_v38, %v772_v40  ;;  %v773_v48 = vmul.f32 (!%p976_p0), %v700_v46, %v661_v42  ;;  %v669_v9 = vld [vmem:[#allocation2 + $0x48] sm:$0xff] (!%p976_p0) }
 0x13c   : > { %v798_v51 = vadd.f32 %v1342_v38, %v775_v47  ;;  %v813_v53 = vmax.f32 %v797_v43, 0.0 }
 0x13d   : > { %v796_v52 = vadd.f32 %v1342_v38, %v773_v48  ;;  %v811_v54 = vmax.f32 %v795_v44, 0.0  ;;  %v720_v55 = vpop.permute.xlu1 %719  ;;  %v715_v56 = vpop.permute.xlu0 %714 }
 0x13e   : > { %v814_v57 = vmax.f32 %v798_v51, 0.0 }
 0x13f   : > { %v812_v58 = vmax.f32 %v796_v52, 0.0  ;;  %v666_v62 = vld [vmem:[#allocation2 + $0x30] sm:$0xff] }
 0x140   : > { %v664_v50 = vld [vmem:[#allocation2 + $0x20] sm:$0xff]  ;;  %v828_v63 = vpack.c.bf16 %v814_v57, %v813_v53  ;;  %v674_v44 = vld [vmem:[#allocation2 + $0x70] sm:$0xff] }
 0x141   : > { %v776_v60 = vmul.f32 %v715_v56, %v664_v50  ;;  %v667_v61 = vld [vmem:[#allocation2 + $0x38] sm:$0xff]  ;;  %v827_v0 = vpack.c.bf16 %v812_v58, %v811_v54  ;;  %v730_v3 = vpop.permute.xlu1 %729  ;;  %v725_v4 = vpop.permute.xlu0 %724  ;;  %v672_v32 = vld [vmem:[#allocation2 + $0x60] sm:$0xff] }
 0x142   : > { %v665_v49 = vld [vmem:[#allocation2 + $0x28] sm:$0xff]  ;;  %836 = vst [vmem:[%s1301_s18 + $0x8] sm:$0xff] %v828_v63  ;;  %v779_v7 = vmul.f32 %v730_v3, %v667_v61  ;;  %v778_v8 = vmul.f32 %v725_v4, %v666_v62  ;;  %v675_v43 = vld [vmem:[#allocation2 + $0x78] sm:$0xff] }
 0x143   : > { %v777_v59 = vmul.f32 %v720_v55, %v665_v49  ;;  %v799_v2 = vadd.f32 %v1342_v38, %v776_v60  ;;  %835 = vst [vmem:[%s1301_s18] sm:$0xff] %v827_v0  ;;  %v673_v31 = vld [vmem:[#allocation2 + $0x68] sm:$0xff] }
 0x144   : > { %v802_v12 = vadd.f32 %v1342_v38, %v779_v7  ;;  %v801_v13 = vadd.f32 %v1342_v38, %v778_v8 }
 0x145   : > { %v800_v1 = vadd.f32 %v1342_v38, %v777_v59  ;;  %v815_v6 = vmax.f32 %v799_v2, 0.0  ;;  %v740_v14 = vpop.permute.xlu1 %739  ;;  %v735_v15 = vpop.permute.xlu0 %734 }
 0x146   : > { %v818_v16 = vmax.f32 %v802_v12, 0.0  ;;  %v817_v17 = vmax.f32 %v801_v13, 0.0  ;;  %v781_v18 = vmul.f32 %v740_v14, %v669_v9  ;;  %v780_v19 = vmul.f32 %v735_v15, %v668_v10 }
 0x147   : > { %v816_v5 = vmax.f32 %v800_v1, 0.0 }
 0x148   : > { %v830_v22 = vpack.c.bf16 %v818_v16, %v817_v17  ;;  %v804_v23 = vadd.f32 %v1342_v38, %v781_v18  ;;  %v803_v24 = vadd.f32 %v1342_v38, %v780_v19 }
 0x149   : > { %v829_v11 = vpack.c.bf16 %v816_v5, %v815_v6  ;;  %v750_v25 = vpop.permute.xlu1 %749  ;;  %v745_v26 = vpop.permute.xlu0 %744 }
 0x14a   : > { %838 = vst [vmem:[%s1301_s18 + $0x18] sm:$0xff] %v830_v22  ;;  %v820_v27 = vmax.f32 %v804_v23, 0.0  ;;  %v819_v28 = vmax.f32 %v803_v24, 0.0  ;;  %v783_v29 = vmul.f32 %v750_v25, %v671_v20  ;;  %v782_v30 = vmul.f32 %v745_v26, %v670_v21 }
 0x14b   : > { %837 = vst [vmem:[%s1301_s18 + $0x10] sm:$0xff] %v829_v11 }
 0x14c   : > { %v831_v33 = vpack.c.bf16 %v820_v27, %v819_v28  ;;  %v806_v34 = vadd.f32 %v1342_v38, %v783_v29  ;;  %v805_v35 = vadd.f32 %v1342_v38, %v782_v30 }
 0x14d   : > { %v760_v36 = vpop.permute.xlu1 %759  ;;  %v755_v37 = vpop.permute.xlu0 %754 }
 0x14e   : > { %839 = vst [vmem:[%s1301_s18 + $0x20] sm:$0xff] %v831_v33  ;;  %v822_v39 = vmax.f32 %v806_v34, 0.0  ;;  %v821_v40 = vmax.f32 %v805_v35, 0.0  ;;  %v785_v41 = vmul.f32 %v760_v36, %v673_v31  ;;  %v784_v42 = vmul.f32 %v755_v37, %v672_v32 }
 0x150   : > { %v832_v45 = vpack.c.bf16 %v822_v39, %v821_v40  ;;  %v808_v46 = vadd.f32 %v1342_v38, %v785_v41  ;;  %v807_v47 = vadd.f32 %v1342_v38, %v784_v42 }
 0x151   : > { %v770_v48 = vpop.permute.xlu1 %769 }
 0x152   : > { %840 = vst [vmem:[%s1301_s18 + $0x28] sm:$0xff] %v832_v45  ;;  %v824_v50 = vmax.f32 %v808_v46, 0.0  ;;  %v823_v51 = vmax.f32 %v807_v47, 0.0  ;;  %v787_v52 = vmul.f32 %v770_v48, %v675_v43 }
 0x154   : > { %v833_v54 = vpack.c.bf16 %v824_v50, %v823_v51  ;;  %v810_v55 = vadd.f32 %v1342_v38, %v787_v52 }
 0x156   : > { %841 = vst [vmem:[%s1301_s18 + $0x30] sm:$0xff] %v833_v54  ;;  %v826_v57 = vmax.f32 %v810_v55, 0.0 }
 0x1ae   : > { %v765_v49 = vpop.permute.xlu0 %764 }
 0x1af   : > { %v786_v53 = vmul.f32 %v765_v49, %v674_v44 }
 0x1b1   : > { %v809_v56 = vadd.f32 %v1342_v38, %v786_v53 }
 0x1b3   : > { %v825_v58 = vmax.f32 %v809_v56, 0.0 }
 0x1b5   : > { %v834_v59 = vpack.c.bf16 %v826_v57, %v825_v58 }
 0x1b7   : > { %842 = vst [vmem:[%s1301_s18 + $0x38] sm:$0xff] %v834_v59 }
 0x1b8 PF: > { %s14_s21 = sadd.s32 1, %s1175_s21   ;;  %s1394_s15 = smov %s1155_s16 }
 0x1b9   : > { %p11_p1 = scmp.ge.s32.totalorder %s14_s21, 11   ;;  %s1395_s16 = smov %s1255_s28 }
 0x1ba   : > { %s1396_s17 = smov %s1167_s19  ;;  %s1397_s18 = smov %s1171_s20 }
 0x1bb   : > { %s1398_s19 = smov %s1401_s22  ;;  %s1399_s20 = smov %s1405_s23 }
 0x1bc   :  { %13 = sbr.rel (!%p11_p1) target bundleno = 4 (0x4), region = 126 }

</bundles_post_ra>
